<compile_context>
chip_gen: v6e
topology: v6e:2x2x1
jax: 0.10.0
libtpu: 0.0.40
codegen_flags: <defaults>
</compile_context>

<pallas_src>
import math

import jax
import jax.numpy as jnp
from jax.experimental import pallas as pl
from jax.experimental.pallas import tpu as pltpu


_VMEM_LIMIT_BYTES = 48 * 1024 * 1024  # > 32 MiB default, < v7x's 64 MiB physical


# ---------------------------------------------------------------------------
# Tile helper
# ---------------------------------------------------------------------------
def _pick_tile(dim, target, align):
    """Largest tile <= target that divides `dim` and is a multiple of `align`.

    Falls back to the full dim (always a legal block shape)."""
    if dim <= target:
        return dim
    t = (target // align) * align
    while t >= align:
        if dim % t == 0:
            return t
        t -= align
    return dim


# ---------------------------------------------------------------------------
# Tiled linear (y = x @ w + b) with K-reduction f32 accumulator, bf16 MXU feed
# ---------------------------------------------------------------------------
def _linear_kernel(x_ref, w_ref, b_ref, o_ref, acc_ref):
    k = pl.program_id(2)

    @pl.when(k == 0)
    def _init():
        acc_ref[...] = jnp.zeros_like(acc_ref)

    acc_ref[...] += jnp.dot(
        x_ref[...], w_ref[...], preferred_element_type=jnp.float32
    )

    @pl.when(k == pl.num_programs(2) - 1)
    def _finalize():
        o_ref[...] = (acc_ref[...] + b_ref[...].astype(jnp.float32)).astype(
            o_ref.dtype
        )


def pallas_linear(x, w, b, *, out_dtype=None, tm_target=512, tn_target=1024,
                  tk_target=512):
    """x: (M, K), w: (K, N), b: (N,) f32 -> (M, N) in out_dtype."""
    M, K = x.shape
    K2, N = w.shape
    assert K == K2
    if out_dtype is None:
        out_dtype = x.dtype
    tm = _pick_tile(M, tm_target, 8)
    tn = _pick_tile(N, tn_target, 128)
    tk = _pick_tile(K, tk_target, 128)
    grid = (M // tm, N // tn, K // tk)

    return pl.pallas_call(
        _linear_kernel,
        out_shape=jax.ShapeDtypeStruct((M, N), out_dtype),
        grid=grid,
        in_specs=[
            pl.BlockSpec((tm, tk), lambda i, j, k: (i, k)),
            pl.BlockSpec((tk, tn), lambda i, j, k: (k, j)),
            pl.BlockSpec((1, tn), lambda i, j, k: (0, j)),
        ],
        out_specs=pl.BlockSpec((tm, tn), lambda i, j, k: (i, j)),
        scratch_shapes=[pltpu.VMEM((tm, tn), jnp.float32)],
        compiler_params=pltpu.CompilerParams(
            dimension_semantics=("parallel", "parallel", "arbitrary"),
            vmem_limit_bytes=_VMEM_LIMIT_BYTES,
        ),
    )(x, w, b.reshape(1, N))


# ---------------------------------------------------------------------------
# Flash attention kernel (online softmax over KV tiles, all heads per step).
# 1/sqrt(D) is pre-folded into the QKV projection weights, so Q needs no scale.
# ---------------------------------------------------------------------------
def _make_flash_attn_kernel(num_heads, head_dim):
    H, D = num_heads, head_dim

    def kernel(q_ref, k_ref, v_ref, o_ref, m_sc, l_sc, acc_sc):
        kv = pl.program_id(2)

        @pl.when(kv == 0)
        def _init():
            m_sc[...] = jnp.full(m_sc.shape, -jnp.inf, jnp.float32)
            l_sc[...] = jnp.zeros(l_sc.shape, jnp.float32)
            acc_sc[...] = jnp.zeros(acc_sc.shape, jnp.float32)

        # Static (unrolled) loop over heads -- H is known at trace time.
        # Each head is an independent online-softmax update on its (tq, D) /
        # (tkv, D) slabs sliced directly out of the lane-dense QKV activation.
        # TODO(synk): for H > ~8 switch to lax.fori_loop / a batched dot_general
        # over heads to bound vreg live ranges.
        for h in range(H):
            sl = slice(h * D, (h + 1) * D)
            q = q_ref[0, :, sl]                 # bf16, scale already folded in
            k = k_ref[0, :, sl]
            v = v_ref[0, :, sl]

            # q @ k^T without an explicit transpose: contract on D for both.
            s = jax.lax.dot_general(
                q, k,
                dimension_numbers=(((1,), (1,)), ((), ())),
                preferred_element_type=jnp.float32,
            )                                   # (tq, tkv), f32

            m_prev = m_sc[h]                    # (tq, 1)
            m_new = jnp.maximum(m_prev, s.max(axis=-1, keepdims=True))
            alpha = jnp.exp(m_prev - m_new)
            # Keep exp in f32 (v5e has no bf16 EUP); p is cast to bf16 only for
            # the PV matmul below.
            p = jnp.exp(s - m_new)              # (tq, tkv), f32
            l_sc[h] = alpha * l_sc[h] + p.sum(axis=-1, keepdims=True)
            acc_sc[h] = alpha * acc_sc[h] + jnp.dot(
                p.astype(v.dtype), v, preferred_element_type=jnp.float32
            )
            m_sc[h] = m_new

        @pl.when(kv == pl.num_programs(2) - 1)
        def _finalize():
            # Assemble the context in 'b s (h d)' layout as one (tq, E) value and
            # do a single lane-dense store (avoids H masked vst.msk column stores).
            outs = []
            for h in range(H):
                l = l_sc[h]                           # (tq, 1)
                inv = pl.reciprocal(l, approx=True)   # EUP slot (nearly free)
                inv = inv * (2.0 - l * inv)           # one Newton step
                outs.append(acc_sc[h] * inv)          # (tq, D), f32
            ctx = outs[0] if H == 1 else jnp.concatenate(outs, axis=-1)
            o_ref[0] = ctx.astype(o_ref.dtype)        # (tq, E) unmasked store

    return kernel


def pallas_flash_attention(qkv, num_heads, head_dim, *, tq_target=256,
                           tkv_target=256):
    """qkv: (B, S, 3E) laid out as '(three h d)' -> context (B, S, E)."""
    B, S, three_e = qkv.shape
    E = num_heads * head_dim
    assert three_e == 3 * E
    tq = _pick_tile(S, tq_target, 8)
    tkv = _pick_tile(S, tkv_target, 8)

    if E % 128 == 0:
        # Slice q/k/v straight out of the fused QKV activation via the
        # BlockSpec column index -- no XLA slice/transpose round-trips.
        q_in = k_in = v_in = qkv
        q_col, k_col, v_col = 0, 1, 2
    else:
        # TODO(synk): E not lane-aligned -- fall back to XLA slices (extra HBM
        # traffic) so block last-dims equal the full array dims.
        qkv4 = qkv.reshape(B, S, 3, E)
        q_in, k_in, v_in = qkv4[:, :, 0, :], qkv4[:, :, 1, :], qkv4[:, :, 2, :]
        q_col = k_col = v_col = 0

    kernel = _make_flash_attn_kernel(num_heads, head_dim)

    return pl.pallas_call(
        kernel,
        out_shape=jax.ShapeDtypeStruct((B, S, E), qkv.dtype),
        grid=(B, S // tq, S // tkv),
        in_specs=[
            pl.BlockSpec((1, tq, E), lambda b, qi, ki: (b, qi, q_col)),
            pl.BlockSpec((1, tkv, E), lambda b, qi, ki: (b, ki, k_col)),
            pl.BlockSpec((1, tkv, E), lambda b, qi, ki: (b, ki, v_col)),
        ],
        out_specs=pl.BlockSpec((1, tq, E), lambda b, qi, ki: (b, qi, 0)),
        scratch_shapes=[
            pltpu.VMEM((num_heads, tq, 1), jnp.float32),          # running max
            pltpu.VMEM((num_heads, tq, 1), jnp.float32),          # running sum
            pltpu.VMEM((num_heads, tq, head_dim), jnp.float32),   # accumulator
        ],
        compiler_params=pltpu.CompilerParams(
            dimension_semantics=("parallel", "parallel", "arbitrary"),
            vmem_limit_bytes=_VMEM_LIMIT_BYTES,
        ),
    )(q_in, k_in, v_in)


# ---------------------------------------------------------------------------
# FlashMHA forward
# ---------------------------------------------------------------------------
def flash_mha_forward(params, query, key, value, num_heads):
    """Matches FlashMHA.forward: key/value are ignored (Wqkv acts on query).

    `params` are compute-ready params from prepare_params (bf16 weights, scale
    folded into the Q part of Wqkv)."""
    del key, value
    B, S, E = query.shape
    D = E // num_heads
    compute_dtype = params["wqkv_t"].dtype

    # 1) QKV projection (nn.Linear: y = x @ W^T + b; W pre-transposed, bf16 MXU,
    #    f32 accumulate, bf16 activation out -> halves the K/V HBM stream).
    x2d = query.reshape(B * S, E).astype(compute_dtype)
    qkv = pallas_linear(x2d, params["wqkv_t"], params["bqkv"],
                        out_dtype=compute_dtype)                 # (B*S, 3E)
    qkv = qkv.reshape(B, S, 3 * E)                               # free reshape

    # 2) Flash attention; output already in 'b s (h d)' layout (bf16).
    ctx = pallas_flash_attention(qkv, num_heads, D)              # (B, S, E)

    # 3) Output projection (bf16 MXU, f32 accumulate, f32 result).
    out = pallas_linear(ctx.reshape(B * S, E), params["wout_t"], params["bout"],
                        out_dtype=query.dtype)
    return out.reshape(B, S, E)


def init_params(key, embed_dim):
    """Deterministic nn.Linear-style init (uniform(-1/sqrt(fan_in), +)), f32."""
    k1, k2, k3, k4 = jax.random.split(key, 4)
    bound = 1.0 / math.sqrt(embed_dim)
    wqkv = jax.random.uniform(
        k1, (3 * embed_dim, embed_dim), jnp.float32, -bound, bound
    )
    bqkv = jax.random.uniform(k2, (3 * embed_dim,), jnp.float32, -bound, bound)
    wout = jax.random.uniform(
        k3, (embed_dim, embed_dim), jnp.float32, -bound, bound
    )
    bout = jax.random.uniform(k4, (embed_dim,), jnp.float32, -bound, bound)
    return {
        "wqkv_t": wqkv.T,  # (E, 3E) -- pre-transposed for x @ W^T
        "bqkv": bqkv,
        "wout_t": wout.T,  # (E, E)
        "bout": bout,
    }


def prepare_params(params, num_heads, compute_dtype=jnp.bfloat16):
    """One-time host-side prep: fold 1/sqrt(D) into the Q columns of Wqkv/bqkv
    and cast matmul weights to bf16 (biases stay f32; they are added to the
    f32 accumulator inside the linear kernel)."""
    three_e = params["bqkv"].shape[0]
    E = three_e // 3
    D = E // num_heads
    scale = 1.0 / math.sqrt(D)
    scale_vec = jnp.concatenate(
        [jnp.full((E,), scale, jnp.float32), jnp.ones((2 * E,), jnp.float32)]
    )
    return {
        "wqkv_t": (params["wqkv_t"] * scale_vec[None, :]).astype(compute_dtype),
        "bqkv": params["bqkv"] * scale_vec,
        "wout_t": params["wout_t"].astype(compute_dtype),
        "bout": params["bout"],
    }


# ---------------------------------------------------------------------------
# Reference (pure JAX, f32) for sanity, and main
# ---------------------------------------------------------------------------
def _reference(params, query, num_heads):
    B, S, E = query.shape
    H, D = num_heads, E // num_heads
    qkv = query.reshape(B * S, E) @ params["wqkv_t"] + params["bqkv"]
    qkv = qkv.reshape(B, S, 3, H, D).transpose(2, 0, 3, 1, 4)
    q, k, v = qkv[0], qkv[1], qkv[2]
    s = jnp.einsum("bhqd,bhkd->bhqk", q, k) / math.sqrt(D)
    p = jax.nn.softmax(s, axis=-1)
    ctx = jnp.einsum("bhqk,bhkd->bhqd", p, v)
    ctx = ctx.transpose(0, 2, 1, 3).reshape(B * S, E)
    return (ctx @ params["wout_t"] + params["bout"]).reshape(B, S, E)


if __name__ == "__main__":
    # Small, module-consistent shapes: batch=2, seq=8, embed_dim=128, heads=4
    # (head_dim = 32: divisible by 8 and <= 128 as the module asserts; E=128
    # keeps the QKV slab / output blocks lane-dense).
    B, S, E, H = 2, 8, 128, 4

    key = jax.random.PRNGKey(0)
    kx, kp = jax.random.split(key)
    x = jax.random.normal(kx, (B, S, E), dtype=jnp.float32)
    params = init_params(kp, E)
    cparams = prepare_params(params, H)

    fwd = jax.jit(flash_mha_forward, static_argnums=(4,))
    out = fwd(cparams, x, x, x, H)
    out = jax.block_until_ready(out)

    ref = _reference(params, x, H)
    assert out.shape == (B, S, E)
    assert out.dtype == x.dtype
    # bf16 MXU operands -> modest tolerance vs the pure-f32 reference.
    err = float(jnp.max(jnp.abs(out - ref)))
    assert jnp.allclose(out, ref, atol=3e-2, rtol=3e-2), f"mismatch vs reference ({err})"

    print("KERNEL_OK")
</pallas_src>

<mosaic_0001>
module attributes {stable_mosaic.version = 11 : i64} {
  func.func @kernel(%arg0: i32, %arg1: i32, %arg2: i32, %arg3: memref<1x8x128xbf16, #tpu.memory_space<vmem>>, %arg4: memref<1x8x128xbf16, #tpu.memory_space<vmem>>, %arg5: memref<1x8x128xbf16, #tpu.memory_space<vmem>>, %arg6: memref<1x8x128xbf16, #tpu.memory_space<vmem>>, %arg7: memref<4x8x1xf32, #tpu.memory_space<vmem>>, %arg8: memref<4x8x1xf32, #tpu.memory_space<vmem>>, %arg9: memref<4x8x32xf32, #tpu.memory_space<vmem>>) attributes {dimension_semantics = [#tpu.dimension_semantics<parallel>, #tpu.dimension_semantics<parallel>, #tpu.dimension_semantics<arbitrary>], iteration_bounds = array<i64: 2, 1, 1>, scalar_prefetch = 0 : i64, scratch_operands = 3 : i64, tpu.core_type = #tpu.core_type<tc>, window_params = [{transform_indices = @transform_0, window_bounds = array<i64: 1, 8, 128>}, {transform_indices = @transform_1, window_bounds = array<i64: 1, 8, 128>}, {transform_indices = @transform_2, window_bounds = array<i64: 1, 8, 128>}, {transform_indices = @transform_3, window_bounds = array<i64: 1, 8, 128>}]} {
    %c0_i32 = arith.constant 0 : i32
    %0 = arith.cmpi eq, %arg2, %c0_i32 : i32
    %1 = arith.extui %0 : i1 to i32
    %c0_i32_0 = arith.constant 0 : i32
    %2 = arith.cmpi ne, %1, %c0_i32_0 : i32
    scf.if %2 {
      %cst_119 = arith.constant 0xFF800000 : f32
      %162 = vector.broadcast %cst_119 : f32 to vector<4x8x1xf32>
      %c0_120 = arith.constant 0 : index
      %c0_121 = arith.constant 0 : index
      %c0_122 = arith.constant 0 : index
      %163 = vector.load %arg7[%c0_120, %c0_121, %c0_122] : memref<4x8x1xf32, #tpu.memory_space<vmem>>, vector<4x8x1xf32>
      tpu.vector_store %arg7[%c0_120, %c0_121, %c0_122], %162 {strides = array<i32>} : memref<4x8x1xf32, #tpu.memory_space<vmem>>, vector<4x8x1xf32>,
      %cst_123 = arith.constant 0.000000e+00 : f32
      %164 = vector.broadcast %cst_123 : f32 to vector<4x8x1xf32>
      %c0_124 = arith.constant 0 : index
      %c0_125 = arith.constant 0 : index
      %c0_126 = arith.constant 0 : index
      %165 = vector.load %arg8[%c0_124, %c0_125, %c0_126] : memref<4x8x1xf32, #tpu.memory_space<vmem>>, vector<4x8x1xf32>
      tpu.vector_store %arg8[%c0_124, %c0_125, %c0_126], %164 {strides = array<i32>} : memref<4x8x1xf32, #tpu.memory_space<vmem>>, vector<4x8x1xf32>,
      %cst_127 = arith.constant 0.000000e+00 : f32
      %166 = vector.broadcast %cst_127 : f32 to vector<4x8x32xf32>
      %c0_128 = arith.constant 0 : index
      %c0_129 = arith.constant 0 : index
      %c0_130 = arith.constant 0 : index
      %167 = vector.load %arg9[%c0_128, %c0_129, %c0_130] : memref<4x8x32xf32, #tpu.memory_space<vmem>>, vector<4x8x32xf32>
      tpu.vector_store %arg9[%c0_128, %c0_129, %c0_130], %166 {strides = array<i32>} : memref<4x8x32xf32, #tpu.memory_space<vmem>>, vector<4x8x32xf32>,
    } else {
    }
    %c0 = arith.constant 0 : index
    %c0_1 = arith.constant 0 : index
    %c0_2 = arith.constant 0 : index
    %3 = vector.load %arg3[%c0, %c0_1, %c0_2] : memref<1x8x128xbf16, #tpu.memory_space<vmem>>, vector<1x8x32xbf16>
    %4 = vector.shape_cast %3 : vector<1x8x32xbf16> to vector<8x32xbf16>
    %c0_3 = arith.constant 0 : index
    %c0_4 = arith.constant 0 : index
    %c0_5 = arith.constant 0 : index
    %5 = vector.load %arg4[%c0_3, %c0_4, %c0_5] : memref<1x8x128xbf16, #tpu.memory_space<vmem>>, vector<1x8x32xbf16>
    %6 = vector.shape_cast %5 : vector<1x8x32xbf16> to vector<8x32xbf16>
    %c0_6 = arith.constant 0 : index
    %c0_7 = arith.constant 0 : index
    %c0_8 = arith.constant 0 : index
    %7 = vector.load %arg5[%c0_6, %c0_7, %c0_8] : memref<1x8x128xbf16, #tpu.memory_space<vmem>>, vector<1x8x32xbf16>
    %8 = vector.shape_cast %7 : vector<1x8x32xbf16> to vector<8x32xbf16>
    %cst = arith.constant dense<0.000000e+00> : vector<8x8xf32>
    %9 = tpu.matmul %4, %6, %cst {dimension_numbers = #tpu.dot_dimension_numbers<[1], [1], [0], [0], [0, 0, 1, 0], [], []>} : vector<8x32xbf16>, vector<8x32xbf16>, vector<8x8xf32> -> vector<8x8xf32>
    %c0_9 = arith.constant 0 : index
    %c0_10 = arith.constant 0 : index
    %c0_11 = arith.constant 0 : index
    %10 = vector.load %arg7[%c0_9, %c0_10, %c0_11] : memref<4x8x1xf32, #tpu.memory_space<vmem>>, vector<1x8x1xf32>
    %11 = vector.shape_cast %10 : vector<1x8x1xf32> to vector<8x1xf32>
    %cst_12 = arith.constant dense<0xFF800000> : vector<8xf32>
    %12 = vector.multi_reduction <maximumf>, %9, %cst_12 [1] : vector<8x8xf32> to vector<8xf32>
    %13 = vector.shape_cast %12 : vector<8xf32> to vector<8x1xf32>
    %14 = arith.maximumf %11, %13 : vector<8x1xf32>
    %15 = arith.subf %11, %14 : vector<8x1xf32>
    %16 = math.exp %15 : vector<8x1xf32>
    %17 = vector.broadcast %14 : vector<8x1xf32> to vector<8x8xf32>
    %18 = arith.subf %9, %17 : vector<8x8xf32>
    %19 = math.exp %18 : vector<8x8xf32>
    %c0_13 = arith.constant 0 : index
    %c0_14 = arith.constant 0 : index
    %c0_15 = arith.constant 0 : index
    %20 = vector.load %arg8[%c0_13, %c0_14, %c0_15] : memref<4x8x1xf32, #tpu.memory_space<vmem>>, vector<1x8x1xf32>
    %21 = vector.shape_cast %20 : vector<1x8x1xf32> to vector<8x1xf32>
    %22 = arith.mulf %16, %21 : vector<8x1xf32>
    %cst_16 = arith.constant dense<0.000000e+00> : vector<8xf32>
    %23 = vector.multi_reduction <add>, %19, %cst_16 [1] : vector<8x8xf32> to vector<8xf32>
    %24 = vector.shape_cast %23 : vector<8xf32> to vector<8x1xf32>
    %25 = arith.addf %22, %24 : vector<8x1xf32>
    %c0_17 = arith.constant 0 : index
    %c0_18 = arith.constant 0 : index
    %c0_19 = arith.constant 0 : index
    %26 = vector.load %arg8[%c0_17, %c0_18, %c0_19] : memref<4x8x1xf32, #tpu.memory_space<vmem>>, vector<1x8x1xf32>
    %27 = vector.shape_cast %26 : vector<1x8x1xf32> to vector<8x1xf32>
    %28 = vector.shape_cast %25 : vector<8x1xf32> to vector<1x8x1xf32>
    tpu.vector_store %arg8[%c0_17, %c0_18, %c0_19], %28 {strides = array<i32>} : memref<4x8x1xf32, #tpu.memory_space<vmem>>, vector<1x8x1xf32>,
    %c0_20 = arith.constant 0 : index
    %c0_21 = arith.constant 0 : index
    %c0_22 = arith.constant 0 : index
    %29 = vector.load %arg9[%c0_20, %c0_21, %c0_22] : memref<4x8x32xf32, #tpu.memory_space<vmem>>, vector<1x8x32xf32>
    %30 = vector.shape_cast %29 : vector<1x8x32xf32> to vector<8x32xf32>
    %31 = vector.broadcast %16 : vector<8x1xf32> to vector<8x32xf32>
    %32 = arith.mulf %31, %30 : vector<8x32xf32>
    %33 = arith.truncf %19 : vector<8x8xf32> to vector<8x8xbf16>
    %cst_23 = arith.constant dense<0.000000e+00> : vector<8x32xf32>
    %34 = tpu.matmul %33, %8, %cst_23 {dimension_numbers = #tpu.dot_dimension_numbers<[1], [0], [0], [1], [0, 0, 1, 1], [], []>} : vector<8x8xbf16>, vector<8x32xbf16>, vector<8x32xf32> -> vector<8x32xf32>
    %35 = arith.addf %32, %34 : vector<8x32xf32>
    %c0_24 = arith.constant 0 : index
    %c0_25 = arith.constant 0 : index
    %c0_26 = arith.constant 0 : index
    %36 = vector.load %arg9[%c0_24, %c0_25, %c0_26] : memref<4x8x32xf32, #tpu.memory_space<vmem>>, vector<1x8x32xf32>
    %37 = vector.shape_cast %36 : vector<1x8x32xf32> to vector<8x32xf32>
    %38 = vector.shape_cast %35 : vector<8x32xf32> to vector<1x8x32xf32>
    tpu.vector_store %arg9[%c0_24, %c0_25, %c0_26], %38 {strides = array<i32>} : memref<4x8x32xf32, #tpu.memory_space<vmem>>, vector<1x8x32xf32>,
    %c0_27 = arith.constant 0 : index
    %c0_28 = arith.constant 0 : index
    %c0_29 = arith.constant 0 : index
    %39 = vector.load %arg7[%c0_27, %c0_28, %c0_29] : memref<4x8x1xf32, #tpu.memory_space<vmem>>, vector<1x8x1xf32>
    %40 = vector.shape_cast %39 : vector<1x8x1xf32> to vector<8x1xf32>
    %41 = vector.shape_cast %14 : vector<8x1xf32> to vector<1x8x1xf32>
    tpu.vector_store %arg7[%c0_27, %c0_28, %c0_29], %41 {strides = array<i32>} : memref<4x8x1xf32, #tpu.memory_space<vmem>>, vector<1x8x1xf32>,
    %c0_30 = arith.constant 0 : index
    %c0_31 = arith.constant 0 : index
    %c32 = arith.constant 32 : index
    %42 = vector.load %arg3[%c0_30, %c0_31, %c32] : memref<1x8x128xbf16, #tpu.memory_space<vmem>>, vector<1x8x32xbf16>
    %43 = vector.shape_cast %42 : vector<1x8x32xbf16> to vector<8x32xbf16>
    %c0_32 = arith.constant 0 : index
    %c0_33 = arith.constant 0 : index
    %c32_34 = arith.constant 32 : index
    %44 = vector.load %arg4[%c0_32, %c0_33, %c32_34] : memref<1x8x128xbf16, #tpu.memory_space<vmem>>, vector<1x8x32xbf16>
    %45 = vector.shape_cast %44 : vector<1x8x32xbf16> to vector<8x32xbf16>
    %c0_35 = arith.constant 0 : index
    %c0_36 = arith.constant 0 : index
    %c32_37 = arith.constant 32 : index
    %46 = vector.load %arg5[%c0_35, %c0_36, %c32_37] : memref<1x8x128xbf16, #tpu.memory_space<vmem>>, vector<1x8x32xbf16>
    %47 = vector.shape_cast %46 : vector<1x8x32xbf16> to vector<8x32xbf16>
    %cst_38 = arith.constant dense<0.000000e+00> : vector<8x8xf32>
    %48 = tpu.matmul %43, %45, %cst_38 {dimension_numbers = #tpu.dot_dimension_numbers<[1], [1], [0], [0], [0, 0, 1, 0], [], []>} : vector<8x32xbf16>, vector<8x32xbf16>, vector<8x8xf32> -> vector<8x8xf32>
    %c1 = arith.constant 1 : index
    %c0_39 = arith.constant 0 : index
    %c0_40 = arith.constant 0 : index
    %49 = vector.load %arg7[%c1, %c0_39, %c0_40] : memref<4x8x1xf32, #tpu.memory_space<vmem>>, vector<1x8x1xf32>
    %50 = vector.shape_cast %49 : vector<1x8x1xf32> to vector<8x1xf32>
    %cst_41 = arith.constant dense<0xFF800000> : vector<8xf32>
    %51 = vector.multi_reduction <maximumf>, %48, %cst_41 [1] : vector<8x8xf32> to vector<8xf32>
    %52 = vector.shape_cast %51 : vector<8xf32> to vector<8x1xf32>
    %53 = arith.maximumf %50, %52 : vector<8x1xf32>
    %54 = arith.subf %50, %53 : vector<8x1xf32>
    %55 = math.exp %54 : vector<8x1xf32>
    %56 = vector.broadcast %53 : vector<8x1xf32> to vector<8x8xf32>
    %57 = arith.subf %48, %56 : vector<8x8xf32>
    %58 = math.exp %57 : vector<8x8xf32>
    %c1_42 = arith.constant 1 : index
    %c0_43 = arith.constant 0 : index
    %c0_44 = arith.constant 0 : index
    %59 = vector.load %arg8[%c1_42, %c0_43, %c0_44] : memref<4x8x1xf32, #tpu.memory_space<vmem>>, vector<1x8x1xf32>
    %60 = vector.shape_cast %59 : vector<1x8x1xf32> to vector<8x1xf32>
    %61 = arith.mulf %55, %60 : vector<8x1xf32>
    %cst_45 = arith.constant dense<0.000000e+00> : vector<8xf32>
    %62 = vector.multi_reduction <add>, %58, %cst_45 [1] : vector<8x8xf32> to vector<8xf32>
    %63 = vector.shape_cast %62 : vector<8xf32> to vector<8x1xf32>
    %64 = arith.addf %61, %63 : vector<8x1xf32>
    %c1_46 = arith.constant 1 : index
    %c0_47 = arith.constant 0 : index
    %c0_48 = arith.constant 0 : index
    %65 = vector.load %arg8[%c1_46, %c0_47, %c0_48] : memref<4x8x1xf32, #tpu.memory_space<vmem>>, vector<1x8x1xf32>
    %66 = vector.shape_cast %65 : vector<1x8x1xf32> to vector<8x1xf32>
    %67 = vector.shape_cast %64 : vector<8x1xf32> to vector<1x8x1xf32>
    tpu.vector_store %arg8[%c1_46, %c0_47, %c0_48], %67 {strides = array<i32>} : memref<4x8x1xf32, #tpu.memory_space<vmem>>, vector<1x8x1xf32>,
    %c1_49 = arith.constant 1 : index
    %c0_50 = arith.constant 0 : index
    %c0_51 = arith.constant 0 : index
    %68 = vector.load %arg9[%c1_49, %c0_50, %c0_51] : memref<4x8x32xf32, #tpu.memory_space<vmem>>, vector<1x8x32xf32>
    %69 = vector.shape_cast %68 : vector<1x8x32xf32> to vector<8x32xf32>
    %70 = vector.broadcast %55 : vector<8x1xf32> to vector<8x32xf32>
    %71 = arith.mulf %70, %69 : vector<8x32xf32>
    %72 = arith.truncf %58 : vector<8x8xf32> to vector<8x8xbf16>
    %cst_52 = arith.constant dense<0.000000e+00> : vector<8x32xf32>
    %73 = tpu.matmul %72, %47, %cst_52 {dimension_numbers = #tpu.dot_dimension_numbers<[1], [0], [0], [1], [0, 0, 1, 1], [], []>} : vector<8x8xbf16>, vector<8x32xbf16>, vector<8x32xf32> -> vector<8x32xf32>
    %74 = arith.addf %71, %73 : vector<8x32xf32>
    %c1_53 = arith.constant 1 : index
    %c0_54 = arith.constant 0 : index
    %c0_55 = arith.constant 0 : index
    %75 = vector.load %arg9[%c1_53, %c0_54, %c0_55] : memref<4x8x32xf32, #tpu.memory_space<vmem>>, vector<1x8x32xf32>
    %76 = vector.shape_cast %75 : vector<1x8x32xf32> to vector<8x32xf32>
    %77 = vector.shape_cast %74 : vector<8x32xf32> to vector<1x8x32xf32>
    tpu.vector_store %arg9[%c1_53, %c0_54, %c0_55], %77 {strides = array<i32>} : memref<4x8x32xf32, #tpu.memory_space<vmem>>, vector<1x8x32xf32>,
    %c1_56 = arith.constant 1 : index
    %c0_57 = arith.constant 0 : index
    %c0_58 = arith.constant 0 : index
    %78 = vector.load %arg7[%c1_56, %c0_57, %c0_58] : memref<4x8x1xf32, #tpu.memory_space<vmem>>, vector<1x8x1xf32>
    %79 = vector.shape_cast %78 : vector<1x8x1xf32> to vector<8x1xf32>
    %80 = vector.shape_cast %53 : vector<8x1xf32> to vector<1x8x1xf32>
    tpu.vector_store %arg7[%c1_56, %c0_57, %c0_58], %80 {strides = array<i32>} : memref<4x8x1xf32, #tpu.memory_space<vmem>>, vector<1x8x1xf32>,
    %c0_59 = arith.constant 0 : index
    %c0_60 = arith.constant 0 : index
    %c64 = arith.constant 64 : index
    %81 = vector.load %arg3[%c0_59, %c0_60, %c64] : memref<1x8x128xbf16, #tpu.memory_space<vmem>>, vector<1x8x32xbf16>
    %82 = vector.shape_cast %81 : vector<1x8x32xbf16> to vector<8x32xbf16>
    %c0_61 = arith.constant 0 : index
    %c0_62 = arith.constant 0 : index
    %c64_63 = arith.constant 64 : index
    %83 = vector.load %arg4[%c0_61, %c0_62, %c64_63] : memref<1x8x128xbf16, #tpu.memory_space<vmem>>, vector<1x8x32xbf16>
    %84 = vector.shape_cast %83 : vector<1x8x32xbf16> to vector<8x32xbf16>
    %c0_64 = arith.constant 0 : index
    %c0_65 = arith.constant 0 : index
    %c64_66 = arith.constant 64 : index
    %85 = vector.load %arg5[%c0_64, %c0_65, %c64_66] : memref<1x8x128xbf16, #tpu.memory_space<vmem>>, vector<1x8x32xbf16>
    %86 = vector.shape_cast %85 : vector<1x8x32xbf16> to vector<8x32xbf16>
    %cst_67 = arith.constant dense<0.000000e+00> : vector<8x8xf32>
    %87 = tpu.matmul %82, %84, %cst_67 {dimension_numbers = #tpu.dot_dimension_numbers<[1], [1], [0], [0], [0, 0, 1, 0], [], []>} : vector<8x32xbf16>, vector<8x32xbf16>, vector<8x8xf32> -> vector<8x8xf32>
    %c2 = arith.constant 2 : index
    %c0_68 = arith.constant 0 : index
    %c0_69 = arith.constant 0 : index
    %88 = vector.load %arg7[%c2, %c0_68, %c0_69] : memref<4x8x1xf32, #tpu.memory_space<vmem>>, vector<1x8x1xf32>
    %89 = vector.shape_cast %88 : vector<1x8x1xf32> to vector<8x1xf32>
    %cst_70 = arith.constant dense<0xFF800000> : vector<8xf32>
    %90 = vector.multi_reduction <maximumf>, %87, %cst_70 [1] : vector<8x8xf32> to vector<8xf32>
    %91 = vector.shape_cast %90 : vector<8xf32> to vector<8x1xf32>
    %92 = arith.maximumf %89, %91 : vector<8x1xf32>
    %93 = arith.subf %89, %92 : vector<8x1xf32>
    %94 = math.exp %93 : vector<8x1xf32>
    %95 = vector.broadcast %92 : vector<8x1xf32> to vector<8x8xf32>
    %96 = arith.subf %87, %95 : vector<8x8xf32>
    %97 = math.exp %96 : vector<8x8xf32>
    %c2_71 = arith.constant 2 : index
    %c0_72 = arith.constant 0 : index
    %c0_73 = arith.constant 0 : index
    %98 = vector.load %arg8[%c2_71, %c0_72, %c0_73] : memref<4x8x1xf32, #tpu.memory_space<vmem>>, vector<1x8x1xf32>
    %99 = vector.shape_cast %98 : vector<1x8x1xf32> to vector<8x1xf32>
    %100 = arith.mulf %94, %99 : vector<8x1xf32>
    %cst_74 = arith.constant dense<0.000000e+00> : vector<8xf32>
    %101 = vector.multi_reduction <add>, %97, %cst_74 [1] : vector<8x8xf32> to vector<8xf32>
    %102 = vector.shape_cast %101 : vector<8xf32> to vector<8x1xf32>
    %103 = arith.addf %100, %102 : vector<8x1xf32>
    %c2_75 = arith.constant 2 : index
    %c0_76 = arith.constant 0 : index
    %c0_77 = arith.constant 0 : index
    %104 = vector.load %arg8[%c2_75, %c0_76, %c0_77] : memref<4x8x1xf32, #tpu.memory_space<vmem>>, vector<1x8x1xf32>
    %105 = vector.shape_cast %104 : vector<1x8x1xf32> to vector<8x1xf32>
    %106 = vector.shape_cast %103 : vector<8x1xf32> to vector<1x8x1xf32>
    tpu.vector_store %arg8[%c2_75, %c0_76, %c0_77], %106 {strides = array<i32>} : memref<4x8x1xf32, #tpu.memory_space<vmem>>, vector<1x8x1xf32>,
    %c2_78 = arith.constant 2 : index
    %c0_79 = arith.constant 0 : index
    %c0_80 = arith.constant 0 : index
    %107 = vector.load %arg9[%c2_78, %c0_79, %c0_80] : memref<4x8x32xf32, #tpu.memory_space<vmem>>, vector<1x8x32xf32>
    %108 = vector.shape_cast %107 : vector<1x8x32xf32> to vector<8x32xf32>
    %109 = vector.broadcast %94 : vector<8x1xf32> to vector<8x32xf32>
    %110 = arith.mulf %109, %108 : vector<8x32xf32>
    %111 = arith.truncf %97 : vector<8x8xf32> to vector<8x8xbf16>
    %cst_81 = arith.constant dense<0.000000e+00> : vector<8x32xf32>
    %112 = tpu.matmul %111, %86, %cst_81 {dimension_numbers = #tpu.dot_dimension_numbers<[1], [0], [0], [1], [0, 0, 1, 1], [], []>} : vector<8x8xbf16>, vector<8x32xbf16>, vector<8x32xf32> -> vector<8x32xf32>
    %113 = arith.addf %110, %112 : vector<8x32xf32>
    %c2_82 = arith.constant 2 : index
    %c0_83 = arith.constant 0 : index
    %c0_84 = arith.constant 0 : index
    %114 = vector.load %arg9[%c2_82, %c0_83, %c0_84] : memref<4x8x32xf32, #tpu.memory_space<vmem>>, vector<1x8x32xf32>
    %115 = vector.shape_cast %114 : vector<1x8x32xf32> to vector<8x32xf32>
    %116 = vector.shape_cast %113 : vector<8x32xf32> to vector<1x8x32xf32>
    tpu.vector_store %arg9[%c2_82, %c0_83, %c0_84], %116 {strides = array<i32>} : memref<4x8x32xf32, #tpu.memory_space<vmem>>, vector<1x8x32xf32>,
    %c2_85 = arith.constant 2 : index
    %c0_86 = arith.constant 0 : index
    %c0_87 = arith.constant 0 : index
    %117 = vector.load %arg7[%c2_85, %c0_86, %c0_87] : memref<4x8x1xf32, #tpu.memory_space<vmem>>, vector<1x8x1xf32>
    %118 = vector.shape_cast %117 : vector<1x8x1xf32> to vector<8x1xf32>
    %119 = vector.shape_cast %92 : vector<8x1xf32> to vector<1x8x1xf32>
    tpu.vector_store %arg7[%c2_85, %c0_86, %c0_87], %119 {strides = array<i32>} : memref<4x8x1xf32, #tpu.memory_space<vmem>>, vector<1x8x1xf32>,
    %c0_88 = arith.constant 0 : index
    %c0_89 = arith.constant 0 : index
    %c96 = arith.constant 96 : index
    %120 = vector.load %arg3[%c0_88, %c0_89, %c96] : memref<1x8x128xbf16, #tpu.memory_space<vmem>>, vector<1x8x32xbf16>
    %121 = vector.shape_cast %120 : vector<1x8x32xbf16> to vector<8x32xbf16>
    %c0_90 = arith.constant 0 : index
    %c0_91 = arith.constant 0 : index
    %c96_92 = arith.constant 96 : index
    %122 = vector.load %arg4[%c0_90, %c0_91, %c96_92] : memref<1x8x128xbf16, #tpu.memory_space<vmem>>, vector<1x8x32xbf16>
    %123 = vector.shape_cast %122 : vector<1x8x32xbf16> to vector<8x32xbf16>
    %c0_93 = arith.constant 0 : index
    %c0_94 = arith.constant 0 : index
    %c96_95 = arith.constant 96 : index
    %124 = vector.load %arg5[%c0_93, %c0_94, %c96_95] : memref<1x8x128xbf16, #tpu.memory_space<vmem>>, vector<1x8x32xbf16>
    %125 = vector.shape_cast %124 : vector<1x8x32xbf16> to vector<8x32xbf16>
    %cst_96 = arith.constant dense<0.000000e+00> : vector<8x8xf32>
    %126 = tpu.matmul %121, %123, %cst_96 {dimension_numbers = #tpu.dot_dimension_numbers<[1], [1], [0], [0], [0, 0, 1, 0], [], []>} : vector<8x32xbf16>, vector<8x32xbf16>, vector<8x8xf32> -> vector<8x8xf32>
    %c3 = arith.constant 3 : index
    %c0_97 = arith.constant 0 : index
    %c0_98 = arith.constant 0 : index
    %127 = vector.load %arg7[%c3, %c0_97, %c0_98] : memref<4x8x1xf32, #tpu.memory_space<vmem>>, vector<1x8x1xf32>
    %128 = vector.shape_cast %127 : vector<1x8x1xf32> to vector<8x1xf32>
    %cst_99 = arith.constant dense<0xFF800000> : vector<8xf32>
    %129 = vector.multi_reduction <maximumf>, %126, %cst_99 [1] : vector<8x8xf32> to vector<8xf32>
    %130 = vector.shape_cast %129 : vector<8xf32> to vector<8x1xf32>
    %131 = arith.maximumf %128, %130 : vector<8x1xf32>
    %132 = arith.subf %128, %131 : vector<8x1xf32>
    %133 = math.exp %132 : vector<8x1xf32>
    %134 = vector.broadcast %131 : vector<8x1xf32> to vector<8x8xf32>
    %135 = arith.subf %126, %134 : vector<8x8xf32>
    %136 = math.exp %135 : vector<8x8xf32>
    %c3_100 = arith.constant 3 : index
    %c0_101 = arith.constant 0 : index
    %c0_102 = arith.constant 0 : index
    %137 = vector.load %arg8[%c3_100, %c0_101, %c0_102] : memref<4x8x1xf32, #tpu.memory_space<vmem>>, vector<1x8x1xf32>
    %138 = vector.shape_cast %137 : vector<1x8x1xf32> to vector<8x1xf32>
    %139 = arith.mulf %133, %138 : vector<8x1xf32>
    %cst_103 = arith.constant dense<0.000000e+00> : vector<8xf32>
    %140 = vector.multi_reduction <add>, %136, %cst_103 [1] : vector<8x8xf32> to vector<8xf32>
    %141 = vector.shape_cast %140 : vector<8xf32> to vector<8x1xf32>
    %142 = arith.addf %139, %141 : vector<8x1xf32>
    %c3_104 = arith.constant 3 : index
    %c0_105 = arith.constant 0 : index
    %c0_106 = arith.constant 0 : index
    %143 = vector.load %arg8[%c3_104, %c0_105, %c0_106] : memref<4x8x1xf32, #tpu.memory_space<vmem>>, vector<1x8x1xf32>
    %144 = vector.shape_cast %143 : vector<1x8x1xf32> to vector<8x1xf32>
    %145 = vector.shape_cast %142 : vector<8x1xf32> to vector<1x8x1xf32>
    tpu.vector_store %arg8[%c3_104, %c0_105, %c0_106], %145 {strides = array<i32>} : memref<4x8x1xf32, #tpu.memory_space<vmem>>, vector<1x8x1xf32>,
    %c3_107 = arith.constant 3 : index
    %c0_108 = arith.constant 0 : index
    %c0_109 = arith.constant 0 : index
    %146 = vector.load %arg9[%c3_107, %c0_108, %c0_109] : memref<4x8x32xf32, #tpu.memory_space<vmem>>, vector<1x8x32xf32>
    %147 = vector.shape_cast %146 : vector<1x8x32xf32> to vector<8x32xf32>
    %148 = vector.broadcast %133 : vector<8x1xf32> to vector<8x32xf32>
    %149 = arith.mulf %148, %147 : vector<8x32xf32>
    %150 = arith.truncf %136 : vector<8x8xf32> to vector<8x8xbf16>
    %cst_110 = arith.constant dense<0.000000e+00> : vector<8x32xf32>
    %151 = tpu.matmul %150, %125, %cst_110 {dimension_numbers = #tpu.dot_dimension_numbers<[1], [0], [0], [1], [0, 0, 1, 1], [], []>} : vector<8x8xbf16>, vector<8x32xbf16>, vector<8x32xf32> -> vector<8x32xf32>
    %152 = arith.addf %149, %151 : vector<8x32xf32>
    %c3_111 = arith.constant 3 : index
    %c0_112 = arith.constant 0 : index
    %c0_113 = arith.constant 0 : index
    %153 = vector.load %arg9[%c3_111, %c0_112, %c0_113] : memref<4x8x32xf32, #tpu.memory_space<vmem>>, vector<1x8x32xf32>
    %154 = vector.shape_cast %153 : vector<1x8x32xf32> to vector<8x32xf32>
    %155 = vector.shape_cast %152 : vector<8x32xf32> to vector<1x8x32xf32>
    tpu.vector_store %arg9[%c3_111, %c0_112, %c0_113], %155 {strides = array<i32>} : memref<4x8x32xf32, #tpu.memory_space<vmem>>, vector<1x8x32xf32>,
    %c3_114 = arith.constant 3 : index
    %c0_115 = arith.constant 0 : index
    %c0_116 = arith.constant 0 : index
    %156 = vector.load %arg7[%c3_114, %c0_115, %c0_116] : memref<4x8x1xf32, #tpu.memory_space<vmem>>, vector<1x8x1xf32>
    %157 = vector.shape_cast %156 : vector<1x8x1xf32> to vector<8x1xf32>
    %158 = vector.shape_cast %131 : vector<8x1xf32> to vector<1x8x1xf32>
    tpu.vector_store %arg7[%c3_114, %c0_115, %c0_116], %158 {strides = array<i32>} : memref<4x8x1xf32, #tpu.memory_space<vmem>>, vector<1x8x1xf32>,
    %c0_i32_117 = arith.constant 0 : i32
    %159 = arith.cmpi eq, %arg2, %c0_i32_117 : i32
    %160 = arith.extui %159 : i1 to i32
    %c0_i32_118 = arith.constant 0 : i32
    %161 = arith.cmpi ne, %160, %c0_i32_118 : i32
    scf.if %161 {
      %c0_119 = arith.constant 0 : index
      %c0_120 = arith.constant 0 : index
      %c0_121 = arith.constant 0 : index
      %162 = vector.load %arg8[%c0_119, %c0_120, %c0_121] : memref<4x8x1xf32, #tpu.memory_space<vmem>>, vector<1x8x1xf32>
      %163 = vector.shape_cast %162 : vector<1x8x1xf32> to vector<8x1xf32>
      %164 = tpu.reciprocal %163 {approx = true} : vector<8x1xf32> -> vector<8x1xf32>
      %165 = arith.mulf %163, %164 : vector<8x1xf32>
      %cst_122 = arith.constant 2.000000e+00 : f32
      %166 = vector.broadcast %cst_122 : f32 to vector<8x1xf32>
      %167 = arith.subf %166, %165 : vector<8x1xf32>
      %168 = arith.mulf %164, %167 : vector<8x1xf32>
      %c0_123 = arith.constant 0 : index
      %c0_124 = arith.constant 0 : index
      %c0_125 = arith.constant 0 : index
      %169 = vector.load %arg9[%c0_123, %c0_124, %c0_125] : memref<4x8x32xf32, #tpu.memory_space<vmem>>, vector<1x8x32xf32>
      %170 = vector.shape_cast %169 : vector<1x8x32xf32> to vector<8x32xf32>
      %171 = vector.broadcast %168 : vector<8x1xf32> to vector<8x32xf32>
      %172 = arith.mulf %170, %171 : vector<8x32xf32>
      %c1_126 = arith.constant 1 : index
      %c0_127 = arith.constant 0 : index
      %c0_128 = arith.constant 0 : index
      %173 = vector.load %arg8[%c1_126, %c0_127, %c0_128] : memref<4x8x1xf32, #tpu.memory_space<vmem>>, vector<1x8x1xf32>
      %174 = vector.shape_cast %173 : vector<1x8x1xf32> to vector<8x1xf32>
      %175 = tpu.reciprocal %174 {approx = true} : vector<8x1xf32> -> vector<8x1xf32>
      %176 = arith.mulf %174, %175 : vector<8x1xf32>
      %cst_129 = arith.constant 2.000000e+00 : f32
      %177 = vector.broadcast %cst_129 : f32 to vector<8x1xf32>
      %178 = arith.subf %177, %176 : vector<8x1xf32>
      %179 = arith.mulf %175, %178 : vector<8x1xf32>
      %c1_130 = arith.constant 1 : index
      %c0_131 = arith.constant 0 : index
      %c0_132 = arith.constant 0 : index
      %180 = vector.load %arg9[%c1_130, %c0_131, %c0_132] : memref<4x8x32xf32, #tpu.memory_space<vmem>>, vector<1x8x32xf32>
      %181 = vector.shape_cast %180 : vector<1x8x32xf32> to vector<8x32xf32>
      %182 = vector.broadcast %179 : vector<8x1xf32> to vector<8x32xf32>
      %183 = arith.mulf %181, %182 : vector<8x32xf32>
      %c2_133 = arith.constant 2 : index
      %c0_134 = arith.constant 0 : index
      %c0_135 = arith.constant 0 : index
      %184 = vector.load %arg8[%c2_133, %c0_134, %c0_135] : memref<4x8x1xf32, #tpu.memory_space<vmem>>, vector<1x8x1xf32>
      %185 = vector.shape_cast %184 : vector<1x8x1xf32> to vector<8x1xf32>
      %186 = tpu.reciprocal %185 {approx = true} : vector<8x1xf32> -> vector<8x1xf32>
      %187 = arith.mulf %185, %186 : vector<8x1xf32>
      %cst_136 = arith.constant 2.000000e+00 : f32
      %188 = vector.broadcast %cst_136 : f32 to vector<8x1xf32>
      %189 = arith.subf %188, %187 : vector<8x1xf32>
      %190 = arith.mulf %186, %189 : vector<8x1xf32>
      %c2_137 = arith.constant 2 : index
      %c0_138 = arith.constant 0 : index
      %c0_139 = arith.constant 0 : index
      %191 = vector.load %arg9[%c2_137, %c0_138, %c0_139] : memref<4x8x32xf32, #tpu.memory_space<vmem>>, vector<1x8x32xf32>
      %192 = vector.shape_cast %191 : vector<1x8x32xf32> to vector<8x32xf32>
      %193 = vector.broadcast %190 : vector<8x1xf32> to vector<8x32xf32>
      %194 = arith.mulf %192, %193 : vector<8x32xf32>
      %c3_140 = arith.constant 3 : index
      %c0_141 = arith.constant 0 : index
      %c0_142 = arith.constant 0 : index
      %195 = vector.load %arg8[%c3_140, %c0_141, %c0_142] : memref<4x8x1xf32, #tpu.memory_space<vmem>>, vector<1x8x1xf32>
      %196 = vector.shape_cast %195 : vector<1x8x1xf32> to vector<8x1xf32>
      %197 = tpu.reciprocal %196 {approx = true} : vector<8x1xf32> -> vector<8x1xf32>
      %198 = arith.mulf %196, %197 : vector<8x1xf32>
      %cst_143 = arith.constant 2.000000e+00 : f32
      %199 = vector.broadcast %cst_143 : f32 to vector<8x1xf32>
      %200 = arith.subf %199, %198 : vector<8x1xf32>
      %201 = arith.mulf %197, %200 : vector<8x1xf32>
      %c3_144 = arith.constant 3 : index
      %c0_145 = arith.constant 0 : index
      %c0_146 = arith.constant 0 : index
      %202 = vector.load %arg9[%c3_144, %c0_145, %c0_146] : memref<4x8x32xf32, #tpu.memory_space<vmem>>, vector<1x8x32xf32>
      %203 = vector.shape_cast %202 : vector<1x8x32xf32> to vector<8x32xf32>
      %204 = vector.broadcast %201 : vector<8x1xf32> to vector<8x32xf32>
      %205 = arith.mulf %203, %204 : vector<8x32xf32>
      %206 = tpu.concatenate %172, %183, %194, %205 in 1 : vector<8x32xf32>, vector<8x32xf32>, vector<8x32xf32>, vector<8x32xf32> -> vector<8x128xf32>
      %207 = arith.truncf %206 : vector<8x128xf32> to vector<8x128xbf16>
      %c0_147 = arith.constant 0 : index
      %c0_148 = arith.constant 0 : index
      %c0_149 = arith.constant 0 : index
      %208 = vector.load %arg6[%c0_147, %c0_148, %c0_149] : memref<1x8x128xbf16, #tpu.memory_space<vmem>>, vector<1x8x128xbf16>
      %209 = vector.shape_cast %208 : vector<1x8x128xbf16> to vector<8x128xbf16>
      %210 = vector.shape_cast %207 : vector<8x128xbf16> to vector<1x8x128xbf16>
      tpu.vector_store %arg6[%c0_147, %c0_148, %c0_149], %210 {strides = array<i32>} : memref<1x8x128xbf16, #tpu.memory_space<vmem>>, vector<1x8x128xbf16>,
    } else {
    }
    return
  }
  func.func @transform_0(%arg0: i32, %arg1: i32, %arg2: i32) -> (i32, i32, i32) {
    %c0_i32 = arith.constant 0 : i32
    %c0_i32_0 = arith.constant 0 : i32
    return %arg0, %arg1, %c0_i32 : i32, i32, i32
  }
  func.func @transform_1(%arg0: i32, %arg1: i32, %arg2: i32) -> (i32, i32, i32) {
    %c1_i32 = arith.constant 1 : i32
    %c0_i32 = arith.constant 0 : i32
    return %arg0, %arg2, %c1_i32 : i32, i32, i32
  }
  func.func @transform_2(%arg0: i32, %arg1: i32, %arg2: i32) -> (i32, i32, i32) {
    %c2_i32 = arith.constant 2 : i32
    %c0_i32 = arith.constant 0 : i32
    return %arg0, %arg2, %c2_i32 : i32, i32, i32
  }
  func.func @transform_3(%arg0: i32, %arg1: i32, %arg2: i32) -> (i32, i32, i32) {
    %c0_i32 = arith.constant 0 : i32
    %c0_i32_0 = arith.constant 0 : i32
    return %arg0, %arg1, %c0_i32 : i32, i32, i32
  }
}

module attributes {stable_mosaic.version = 11 : i64} {
  func.func @_linear_kernel(%arg0: i32, %arg1: i32, %arg2: i32, %arg3: memref<16x128xbf16, #tpu.memory_space<vmem>>, %arg4: memref<128x384xbf16, #tpu.memory_space<vmem>>, %arg5: memref<1x384xf32, #tpu.memory_space<vmem>>, %arg6: memref<16x384xbf16, #tpu.memory_space<vmem>>, %arg7: memref<16x384xf32, #tpu.memory_space<vmem>>) attributes {dimension_semantics = [#tpu.dimension_semantics<parallel>, #tpu.dimension_semantics<parallel>, #tpu.dimension_semantics<arbitrary>], iteration_bounds = array<i64: 1, 1, 1>, scalar_prefetch = 0 : i64, scratch_operands = 1 : i64, tpu.core_type = #tpu.core_type<tc>, window_params = [{transform_indices = @transform_0, window_bounds = array<i64: 16, 128>}, {transform_indices = @transform_1, window_bounds = array<i64: 128, 384>}, {transform_indices = @transform_2, window_bounds = array<i64: 1, 384>}, {transform_indices = @transform_3, window_bounds = array<i64: 16, 384>}]} {
    %c0_i32 = arith.constant 0 : i32
    %0 = arith.cmpi eq, %arg2, %c0_i32 : i32
    %1 = arith.extui %0 : i1 to i32
    %c0_i32_0 = arith.constant 0 : i32
    %2 = arith.cmpi ne, %1, %c0_i32_0 : i32
    scf.if %2 {
      %cst_10 = arith.constant 0.000000e+00 : f32
      %12 = vector.broadcast %cst_10 : f32 to vector<16x384xf32>
      %c0_11 = arith.constant 0 : index
      %c0_12 = arith.constant 0 : index
      %13 = vector.load %arg7[%c0_11, %c0_12] : memref<16x384xf32, #tpu.memory_space<vmem>>, vector<16x384xf32>
      tpu.vector_store %arg7[%c0_11, %c0_12], %12 {strides = array<i32>} : memref<16x384xf32, #tpu.memory_space<vmem>>, vector<16x384xf32>,
    } else {
    }
    %c0 = arith.constant 0 : index
    %c0_1 = arith.constant 0 : index
    %3 = vector.load %arg7[%c0, %c0_1] : memref<16x384xf32, #tpu.memory_space<vmem>>, vector<16x384xf32>
    %c0_2 = arith.constant 0 : index
    %c0_3 = arith.constant 0 : index
    %4 = vector.load %arg3[%c0_2, %c0_3] : memref<16x128xbf16, #tpu.memory_space<vmem>>, vector<16x128xbf16>
    %c0_4 = arith.constant 0 : index
    %c0_5 = arith.constant 0 : index
    %5 = vector.load %arg4[%c0_4, %c0_5] : memref<128x384xbf16, #tpu.memory_space<vmem>>, vector<128x384xbf16>
    %cst = arith.constant dense<0.000000e+00> : vector<16x384xf32>
    %6 = tpu.matmul %4, %5, %cst {dimension_numbers = #tpu.dot_dimension_numbers<[1], [0], [0], [1], [0, 0, 1, 1], [], []>} : vector<16x128xbf16>, vector<128x384xbf16>, vector<16x384xf32> -> vector<16x384xf32>
    %7 = arith.addf %3, %6 : vector<16x384xf32>
    %c0_6 = arith.constant 0 : index
    %c0_7 = arith.constant 0 : index
    %8 = vector.load %arg7[%c0_6, %c0_7] : memref<16x384xf32, #tpu.memory_space<vmem>>, vector<16x384xf32>
    tpu.vector_store %arg7[%c0_6, %c0_7], %7 {strides = array<i32>} : memref<16x384xf32, #tpu.memory_space<vmem>>, vector<16x384xf32>,
    %c0_i32_8 = arith.constant 0 : i32
    %9 = arith.cmpi eq, %arg2, %c0_i32_8 : i32
    %10 = arith.extui %9 : i1 to i32
    %c0_i32_9 = arith.constant 0 : i32
    %11 = arith.cmpi ne, %10, %c0_i32_9 : i32
    scf.if %11 {
      %c0_10 = arith.constant 0 : index
      %c0_11 = arith.constant 0 : index
      %12 = vector.load %arg7[%c0_10, %c0_11] : memref<16x384xf32, #tpu.memory_space<vmem>>, vector<16x384xf32>
      %c0_12 = arith.constant 0 : index
      %c0_13 = arith.constant 0 : index
      %13 = vector.load %arg5[%c0_12, %c0_13] : memref<1x384xf32, #tpu.memory_space<vmem>>, vector<1x384xf32>
      %14 = vector.broadcast %13 : vector<1x384xf32> to vector<16x384xf32>
      %15 = arith.addf %12, %14 : vector<16x384xf32>
      %16 = arith.truncf %15 : vector<16x384xf32> to vector<16x384xbf16>
      %c0_14 = arith.constant 0 : index
      %c0_15 = arith.constant 0 : index
      %17 = vector.load %arg6[%c0_14, %c0_15] : memref<16x384xbf16, #tpu.memory_space<vmem>>, vector<16x384xbf16>
      tpu.vector_store %arg6[%c0_14, %c0_15], %16 {strides = array<i32>} : memref<16x384xbf16, #tpu.memory_space<vmem>>, vector<16x384xbf16>,
    } else {
    }
    return
  }
  func.func @transform_0(%arg0: i32, %arg1: i32, %arg2: i32) -> (i32, i32) {
    %c0_i32 = arith.constant 0 : i32
    return %arg0, %arg2 : i32, i32
  }
  func.func @transform_1(%arg0: i32, %arg1: i32, %arg2: i32) -> (i32, i32) {
    %c0_i32 = arith.constant 0 : i32
    return %arg2, %arg1 : i32, i32
  }
  func.func @transform_2(%arg0: i32, %arg1: i32, %arg2: i32) -> (i32, i32) {
    %c0_i32 = arith.constant 0 : i32
    %c0_i32_0 = arith.constant 0 : i32
    return %c0_i32, %arg1 : i32, i32
  }
  func.func @transform_3(%arg0: i32, %arg1: i32, %arg2: i32) -> (i32, i32) {
    %c0_i32 = arith.constant 0 : i32
    return %arg0, %arg1 : i32, i32
  }
}

module attributes {stable_mosaic.version = 11 : i64} {
  func.func @_linear_kernel(%arg0: i32, %arg1: i32, %arg2: i32, %arg3: memref<16x128xbf16, #tpu.memory_space<vmem>>, %arg4: memref<128x128xbf16, #tpu.memory_space<vmem>>, %arg5: memref<1x128xf32, #tpu.memory_space<vmem>>, %arg6: memref<16x128xf32, #tpu.memory_space<vmem>>, %arg7: memref<16x128xf32, #tpu.memory_space<vmem>>) attributes {dimension_semantics = [#tpu.dimension_semantics<parallel>, #tpu.dimension_semantics<parallel>, #tpu.dimension_semantics<arbitrary>], iteration_bounds = array<i64: 1, 1, 1>, scalar_prefetch = 0 : i64, scratch_operands = 1 : i64, tpu.core_type = #tpu.core_type<tc>, window_params = [{transform_indices = @transform_0, window_bounds = array<i64: 16, 128>}, {transform_indices = @transform_1, window_bounds = array<i64: 128, 128>}, {transform_indices = @transform_2, window_bounds = array<i64: 1, 128>}, {transform_indices = @transform_3, window_bounds = array<i64: 16, 128>}]} {
    %c0_i32 = arith.constant 0 : i32
    %0 = arith.cmpi eq, %arg2, %c0_i32 : i32
    %1 = arith.extui %0 : i1 to i32
    %c0_i32_0 = arith.constant 0 : i32
    %2 = arith.cmpi ne, %1, %c0_i32_0 : i32
    scf.if %2 {
      %cst_10 = arith.constant 0.000000e+00 : f32
      %12 = vector.broadcast %cst_10 : f32 to vector<16x128xf32>
      %c0_11 = arith.constant 0 : index
      %c0_12 = arith.constant 0 : index
      %13 = vector.load %arg7[%c0_11, %c0_12] : memref<16x128xf32, #tpu.memory_space<vmem>>, vector<16x128xf32>
      tpu.vector_store %arg7[%c0_11, %c0_12], %12 {strides = array<i32>} : memref<16x128xf32, #tpu.memory_space<vmem>>, vector<16x128xf32>,
    } else {
    }
    %c0 = arith.constant 0 : index
    %c0_1 = arith.constant 0 : index
    %3 = vector.load %arg7[%c0, %c0_1] : memref<16x128xf32, #tpu.memory_space<vmem>>, vector<16x128xf32>
    %c0_2 = arith.constant 0 : index
    %c0_3 = arith.constant 0 : index
    %4 = vector.load %arg3[%c0_2, %c0_3] : memref<16x128xbf16, #tpu.memory_space<vmem>>, vector<16x128xbf16>
    %c0_4 = arith.constant 0 : index
    %c0_5 = arith.constant 0 : index
    %5 = vector.load %arg4[%c0_4, %c0_5] : memref<128x128xbf16, #tpu.memory_space<vmem>>, vector<128x128xbf16>
    %cst = arith.constant dense<0.000000e+00> : vector<16x128xf32>
    %6 = tpu.matmul %4, %5, %cst {dimension_numbers = #tpu.dot_dimension_numbers<[1], [0], [0], [1], [0, 0, 1, 1], [], []>} : vector<16x128xbf16>, vector<128x128xbf16>, vector<16x128xf32> -> vector<16x128xf32>
    %7 = arith.addf %3, %6 : vector<16x128xf32>
    %c0_6 = arith.constant 0 : index
    %c0_7 = arith.constant 0 : index
    %8 = vector.load %arg7[%c0_6, %c0_7] : memref<16x128xf32, #tpu.memory_space<vmem>>, vector<16x128xf32>
    tpu.vector_store %arg7[%c0_6, %c0_7], %7 {strides = array<i32>} : memref<16x128xf32, #tpu.memory_space<vmem>>, vector<16x128xf32>,
    %c0_i32_8 = arith.constant 0 : i32
    %9 = arith.cmpi eq, %arg2, %c0_i32_8 : i32
    %10 = arith.extui %9 : i1 to i32
    %c0_i32_9 = arith.constant 0 : i32
    %11 = arith.cmpi ne, %10, %c0_i32_9 : i32
    scf.if %11 {
      %c0_10 = arith.constant 0 : index
      %c0_11 = arith.constant 0 : index
      %12 = vector.load %arg7[%c0_10, %c0_11] : memref<16x128xf32, #tpu.memory_space<vmem>>, vector<16x128xf32>
      %c0_12 = arith.constant 0 : index
      %c0_13 = arith.constant 0 : index
      %13 = vector.load %arg5[%c0_12, %c0_13] : memref<1x128xf32, #tpu.memory_space<vmem>>, vector<1x128xf32>
      %14 = vector.broadcast %13 : vector<1x128xf32> to vector<16x128xf32>
      %15 = arith.addf %12, %14 : vector<16x128xf32>
      %c0_14 = arith.constant 0 : index
      %c0_15 = arith.constant 0 : index
      %16 = vector.load %arg6[%c0_14, %c0_15] : memref<16x128xf32, #tpu.memory_space<vmem>>, vector<16x128xf32>
      tpu.vector_store %arg6[%c0_14, %c0_15], %15 {strides = array<i32>} : memref<16x128xf32, #tpu.memory_space<vmem>>, vector<16x128xf32>,
    } else {
    }
    return
  }
  func.func @transform_0(%arg0: i32, %arg1: i32, %arg2: i32) -> (i32, i32) {
    %c0_i32 = arith.constant 0 : i32
    return %arg0, %arg2 : i32, i32
  }
  func.func @transform_1(%arg0: i32, %arg1: i32, %arg2: i32) -> (i32, i32) {
    %c0_i32 = arith.constant 0 : i32
    return %arg2, %arg1 : i32, i32
  }
  func.func @transform_2(%arg0: i32, %arg1: i32, %arg2: i32) -> (i32, i32) {
    %c0_i32 = arith.constant 0 : i32
    %c0_i32_0 = arith.constant 0 : i32
    return %c0_i32, %arg1 : i32, i32
  }
  func.func @transform_3(%arg0: i32, %arg1: i32, %arg2: i32) -> (i32, i32) {
    %c0_i32 = arith.constant 0 : i32
    return %arg0, %arg1 : i32, i32
  }
}

</mosaic_0001>

<bundles_post_ra>
// kernel: flash_mha_forward.3
= control target key start
LH: loop header
LB: loop body
LE: loop exit
PB: predicated region body
PF: predicated region fallthrough
CT: control target
= control target key end

     0   :  { %8 = vsyncpa [#allocation4], 0  ;;  %s493_s12 = smov [#allocation3]   ;;  %s540_s0 = inlined_call_operand.vmem [shape: bf16[16,128], index: 0, kind: input, shape index: {}]   ;;  %s541_s1 = inlined_call_operand.hbm [shape: bf16[128,384], index: 1, kind: input, shape index: {}]   ;;  %s542_s2 = inlined_call_operand.vmem [shape: f32[1,384], index: 2, kind: input, shape index: {}]   ;;  %s543_s3 = inlined_call_operand.vmem [shape: bf16[16,384], index: 3, kind: output, shape index: {}]  }
   0x1   :  { %s16_s13 = sshll.u32 %s493_s12, 4  ;;  %s17_s13 = int_to_ptr.vmem [resolvable:$true] %s16_s13 }
   0x2   :  { %s479_s14 = scalar_lea.vmem %s17_s13, 3072  ;;  %p484_p1 = scmp.lt.s32.totalorder %s17_s13, %s17_s13 }
   0x3   :  { %p480_p0 = scmp.ne.s32.totalorder %s17_s13, %s479_s14  ;;  %p485_p2 = scmp.lt.s32.totalorder %s479_s14, %s479_s14 }
   0x5   :  { %p486_p3 = por %p485_p2, %p484_p1 }
   0x7   :  { %p487_p4 = pnand %p486_p3, %p480_p0 }
   0x9   :  { %490 = shalt.err (!%p487_p4)
}
   0xa   :  { %s494_s15 = smov 192   ;;  %s495_s16 = smov 12  }
   0xb   :  { %22 = dma.hbm_to_vmem [thread:$0]  %s541_s1, 3072, %s17_s13, [#allocation4], %s494_s15, %s494_s15, %s495_s16  }
   0xc   :  { %491 = dma.done.wait [#allocation4], 3072  }
   0xd   :  { %492 = vsyncadd [#allocation4], 4294964224  ;;  %v496_v0 = vmov 0.0   ;;  %vm497_vm0 = vmmov 0   ;;  %v498_v1 = vmov 0   ;;  %v470_v26 = vld [vmem:[%s540_s0] sm:$0xff]   ;;  %v320_v27 = vlaneseq }
   0xe   :  { %412 = vmatprep.subr.bf16.mxu1 %v496_v0  ;;  %428 = vmatprep.mubr.msk.bf16.mxu1 %vm497_vm0, %v496_v0  ;;  %v438_v2 = vld [vmem:[#allocation3 + $0xac] ss:$12 sps:$4 sm:$0xff]   ;;  %v440_v3 = vld [vmem:[#allocation3 + $0xb0] ss:$12 sps:$4 sm:$0xff]   ;;  %v441_v4 = vld [vmem:[#allocation3 + $0xa8] ss:$12 sps:$4 sm:$0xff]  }
   0xf   :  { %245 = vmatprep.mubr.bf16.mxu0 %v498_v1  ;;  %213 = vmatprep.subr.bf16.mxu0 %v438_v2  ;;  %v442_v5 = vld [vmem:[#allocation3 + $0x94] ss:$12 sps:$4 sm:$0xff]   ;;  %v444_v6 = vld [vmem:[#allocation3 + $0x98] ss:$12 sps:$4 sm:$0xff]   ;;  %v445_v7 = vld [vmem:[#allocation3 + $0x90] ss:$12 sps:$4 sm:$0xff]  }
  0x10   :  { %413 = vmatpush3.bf16.msra.mxu1 %v440_v3  ;;  %214 = vmatpush1.bf16.msra.mxu0 %v441_v4  ;;  %v446_v8 = vld [vmem:[#allocation3 + $0x7c] ss:$12 sps:$4 sm:$0xff]   ;;  %v448_v9 = vld [vmem:[#allocation3 + $0x80] ss:$12 sps:$4 sm:$0xff]   ;;  %v449_v10 = vld [vmem:[#allocation3 + $0x78] ss:$12 sps:$4 sm:$0xff]  }
  0x11   :  { %414 = vmatprep.subr.bf16.mxu1 %v496_v0  ;;  %215 = vmatprep.subr.bf16.mxu0 %v442_v5  ;;  %v450_v11 = vld [vmem:[#allocation3 + $0x64] ss:$12 sps:$4 sm:$0xff]   ;;  %v452_v12 = vld [vmem:[#allocation3 + $0x68] ss:$12 sps:$4 sm:$0xff]   ;;  %v453_v13 = vld [vmem:[#allocation3 + $0x60] ss:$12 sps:$4 sm:$0xff]  }
  0x12   :  { %v454_v14 = vld [vmem:[#allocation3 + $0x4c] ss:$12 sps:$4 sm:$0xff]   ;;  %v456_v15 = vld [vmem:[#allocation3 + $0x50] ss:$12 sps:$4 sm:$0xff]   ;;  %v457_v16 = vld [vmem:[#allocation3 + $0x48] ss:$12 sps:$4 sm:$0xff]  }
  0x13   :  { %v458_v17 = vld [vmem:[#allocation3 + $0x34] ss:$12 sps:$4 sm:$0xff]   ;;  %v460_v18 = vld [vmem:[#allocation3 + $0x38] ss:$12 sps:$4 sm:$0xff]   ;;  %v461_v19 = vld [vmem:[#allocation3 + $0x30] ss:$12 sps:$4 sm:$0xff]  }
  0x14   :  { %415 = vmatpush3.bf16.msra.mxu1 %v444_v6  ;;  %216 = vmatpush1.bf16.msra.mxu0 %v445_v7  ;;  %v462_v20 = vld [vmem:[#allocation3 + $0x1c] ss:$12 sps:$4 sm:$0xff]   ;;  %v464_v21 = vld [vmem:[#allocation3 + $0x20] ss:$12 sps:$4 sm:$0xff]   ;;  %v465_v22 = vld [vmem:[#allocation3 + $0x18] ss:$12 sps:$4 sm:$0xff]  }
  0x15   :  { %416 = vmatprep.subr.bf16.mxu1 %v496_v0  ;;  %217 = vmatprep.subr.bf16.mxu0 %v446_v8  ;;  %v466_v23 = vld [vmem:[#allocation3 + $0x4] ss:$12 sps:$4 sm:$0xff]   ;;  %v468_v24 = vld [vmem:[#allocation3 + $0x8] ss:$12 sps:$4 sm:$0xff]   ;;  %v469_v25 = vld [vmem:[#allocation3] ss:$12 sps:$4 sm:$0xff]  }
  0x16   :  { %v321_v28 = vshrl.u32 %v320_v27, 7  ;;  %v318_v30 = vld [vmem:[%s542_s2] sm:$0x7] }
  0x18   :  { %417 = vmatpush3.bf16.msra.mxu1 %v448_v9  ;;  %218 = vmatpush1.bf16.msra.mxu0 %v449_v10  ;;  %v330_v29 = vsub.s32 2, %v321_v28  ;;  %v322_v31 = vsub.s32 0, %v321_v28  ;;  %v326_v32 = vsub.s32 1, %v321_v28 }
  0x19   :  { %418 = vmatprep.subr.bf16.mxu1 %v496_v0  ;;  %219 = vmatprep.subr.bf16.mxu0 %v450_v11 }
  0x1a   :  { %v331_v33 = vrot.slane %v318_v30, %v330_v29  ;;  %v323_v35 = vrot.slane %v318_v30, %v322_v31  ;;  %v327_v36 = vrot.slane %v318_v30, %v326_v32 }
  0x1c   :  { %419 = vmatpush3.bf16.msra.mxu1 %v452_v12  ;;  %220 = vmatpush1.bf16.msra.mxu0 %v453_v13 }
  0x1d   :  { %420 = vmatprep.subr.bf16.mxu1 %v496_v0  ;;  %221 = vmatprep.subr.bf16.mxu0 %v454_v14 }
  0x20   :  { %421 = vmatpush3.bf16.msra.mxu1 %v456_v15  ;;  %222 = vmatpush1.bf16.msra.mxu0 %v457_v16 }
  0x21   :  { %422 = vmatprep.subr.bf16.mxu1 %v496_v0  ;;  %223 = vmatprep.subr.bf16.mxu0 %v458_v17 }
  0x24   :  { %423 = vmatpush3.bf16.msra.mxu1 %v460_v18  ;;  %224 = vmatpush1.bf16.msra.mxu0 %v461_v19 }
  0x25   :  { %424 = vmatprep.subr.bf16.mxu1 %v496_v0  ;;  %225 = vmatprep.subr.bf16.mxu0 %v462_v20 }
  0x28   :  { %425 = vmatpush3.bf16.msra.mxu1 %v464_v21  ;;  %226 = vmatpush1.bf16.msra.mxu0 %v465_v22 }
  0x29   :  { %426 = vmatprep.subr.bf16.mxu1 %v496_v0  ;;  %227 = vmatprep.subr.bf16.mxu0 %v466_v23 }
  0x2c   :  { %427 = vmatpush3.bf16.msra.mxu1 %v468_v24  ;;  %228 = vmatpush1.bf16.msra.mxu0 %v469_v25 }
  0x2f   :  { %429 = vmatmul.mubr.bf16.vlgmr.msra.gmra.mxu1 %v470_v26  ;;  %246 = vmatmul.mubr.bf16.vlgmr.msra.gmra.mxu0 %v470_v26 }
  0xef   :  { %v290_v34 = vpop.f32.mrf.mxu1  ;;  %v247_v38 = vpop.f32.mrf.mxu0 }
  0xf0   :  { %v337_v37 = vadd.f32 %v331_v33, %v290_v34  ;;  %v335_v42 = vadd.f32 %v323_v35, %v247_v38 }
  0xf1   :  { %v430_v39 = vpop.f32.mrf.mxu1  ;;  %v249_v41 = vpop.f32.mrf.mxu0 }
  0xf2   :  { %v400_v40 = vpack.c.bf16 %v337_v37, %v337_v37  ;;  %v336_v43 = vadd.f32 %v327_v36, %v249_v41 }
  0xf3   :  { %v293_v44 = vpop.f32.mrf.mxu1  ;;  %v251_v46 = vpop.f32.mrf.mxu0 }
  0xf4   :  { %362 = vst [vmem:[%s543_s3 + $0x8] sm:$0xf] %v400_v40  ;;  %v340_v45 = vadd.f32 %v331_v33, %v293_v44  ;;  %v399_v47 = vpack.c.bf16 %v336_v43, %v335_v42  ;;  %v338_v51 = vadd.f32 %v323_v35, %v251_v46 }
  0xf5   :  { %v431_v48 = vpop.f32.mrf.mxu1  ;;  %v253_v50 = vpop.f32.mrf.mxu0 }
  0xf6   :  { %v402_v49 = vpack.c.bf16 %v340_v45, %v340_v45  ;;  %361 = vst [vmem:[%s543_s3] sm:$0xff] %v399_v47  ;;  %v339_v52 = vadd.f32 %v327_v36, %v253_v50 }
  0xf8   :  { %364 = vst [vmem:[%s543_s3 + $0x14] sm:$0xf] %v402_v49  ;;  %v401_v53 = vpack.c.bf16 %v339_v52, %v338_v51 }
  0xfa   :  { %363 = vst [vmem:[%s543_s3 + $0xc] sm:$0xff] %v401_v53 }
  0xfb   :  { %369 = vsyncpa [#allocation4], 1 }

// kernel: flash_mha_forward.5
= control target key start
LH: loop header
LB: loop body
LE: loop exit
PB: predicated region body
PF: predicated region fallthrough
CT: control target
= control target key end

     0   :  { %v248_v1 = vmov 0.0   ;;  %vm249_vm0 = vmmov 0   ;;  %s306_s0 = inlined_call_operand.vmem [shape: bf16[16,128], index: 0, kind: input, shape index: {}]   ;;  %s307_s1 = inlined_call_operand.vmem [shape: bf16[128,128], index: 1, kind: input, shape index: {}]   ;;  %s308_s2 = inlined_call_operand.vmem [shape: f32[1,128], index: 2, kind: input, shape index: {}]   ;;  %s309_s3 = inlined_call_operand.hbm [shape: f32[16,128], index: 3, kind: output, shape index: {}]  }
   0x1   :  { %v217_v0 = vld [vmem:[%s307_s1 + $0x38] sm:$0xff]   ;;  %192 = vmatprep.subr.bf16.mxu0 %v248_v1  ;;  %v218_v2 = vld [vmem:[%s307_s1 + $0x30] sm:$0xff]   ;;  %208 = vmatprep.mubr.msk.bf16.mxu0 %vm249_vm0, %v248_v1  ;;  %v219_v3 = vld [vmem:[%s307_s1 + $0x28] sm:$0xff]  }
   0x2   :  { %193 = vmatpush3.bf16.msra.mxu0 %v217_v0 }
   0x3   :  { %194 = vmatprep.subr.bf16.mxu0 %v248_v1 }
   0x6   :  { %195 = vmatpush3.bf16.msra.mxu0 %v218_v2 }
   0x7   :  { %196 = vmatprep.subr.bf16.mxu0 %v248_v1 }
   0x8   :  { %8 = vsyncpa [#allocation4], 0  ;;  %v220_v4 = vld [vmem:[%s307_s1 + $0x20] sm:$0xff]   ;;  %v221_v5 = vld [vmem:[%s307_s1 + $0x18] sm:$0xff]   ;;  %s250_s5 = smov [#allocation3]  }
   0x9   :  { %v222_v6 = vld [vmem:[%s307_s1 + $0x10] sm:$0xff]   ;;  %v223_v7 = vld [vmem:[%s307_s1 + $0x8] sm:$0xff]   ;;  %v224_v8 = vld [vmem:[%s307_s1] sm:$0xff]   ;;  %s162_s6 = sshll.u32 %s250_s5, 4  ;;  %s163_s6 = int_to_ptr.vmem [resolvable:$true] %s162_s6 }
   0xa   :  { %197 = vmatpush3.bf16.msra.mxu0 %v219_v3  ;;  %v225_v9 = vld [vmem:[%s306_s0] sm:$0xff]   ;;  %s226_s1 = scalar_lea.vmem %s163_s6, 256  ;;  %p231_p1 = scmp.lt.s32.totalorder %s163_s6, %s163_s6 }
   0xb   :  { %198 = vmatprep.subr.bf16.mxu0 %v248_v1  ;;  %v182_v10 = vld [vmem:[%s308_s2] ss:$0 sm:$0xff]  ;;  %p227_p0 = scmp.ne.s32.totalorder %s163_s6, %s226_s1  ;;  %p232_p2 = scmp.lt.s32.totalorder %s226_s1, %s226_s1 }
   0xd   :  { %p233_p3 = por %p232_p2, %p231_p1 }
   0xe   :  { %199 = vmatpush3.bf16.msra.mxu0 %v220_v4 }
   0xf   :  { %200 = vmatprep.subr.bf16.mxu0 %v248_v1  ;;  %p234_p4 = pnand %p233_p3, %p227_p0 }
  0x12   :  { %201 = vmatpush3.bf16.msra.mxu0 %v221_v5 }
  0x13   :  { %202 = vmatprep.subr.bf16.mxu0 %v248_v1 }
  0x16   :  { %203 = vmatpush3.bf16.msra.mxu0 %v222_v6 }
  0x17   :  { %204 = vmatprep.subr.bf16.mxu0 %v248_v1 }
  0x1a   :  { %205 = vmatpush3.bf16.msra.mxu0 %v223_v7 }
  0x1b   :  { %206 = vmatprep.subr.bf16.mxu0 %v248_v1 }
  0x1e   :  { %207 = vmatpush3.bf16.msra.mxu0 %v224_v8 }
  0x21   :  { %209 = vmatmul.mubr.bf16.vlgmr.msra.gmra.mxu0 %v225_v9 }
  0xe1   :  { %v130_v11 = vpop.f32.mrf.mxu0 }
  0xe2   :  { %v153_v12 = vadd.f32 %v182_v10, %v130_v11 }
  0xe3   :  { %v210_v13 = vpop.f32.mrf.mxu0 }
  0xe4   :  { %155 = vst [vmem:[#allocation3] sm:$0xff] %v153_v12 }
  0xe5   :  { %v133_v14 = vpop.f32.mrf.mxu0 }
  0xe6   :  { %v154_v15 = vadd.f32 %v182_v10, %v133_v14 }
  0xe7   :  { %v211_v16 = vpop.f32.mrf.mxu0 }
  0xe8   :  { %156 = vst [vmem:[#allocation3 + $0x8] sm:$0xff] %v154_v15 }
  0xe9   :  { %237 = shalt.err (!%p234_p4)
}
  0xea   :  { %s251_s0 = smov 128   ;;  %s252_s2 = smov 8  }
  0xeb   :  { %168 = dma.vmem_to_hbm [thread:$0]  %s163_s6, 256, %s309_s3, [#allocation4], %s251_s0, %s251_s0, %s252_s2  }
  0xec   :  { %246 = dma.done.wait [#allocation4], 256  }
  0xed   :  { %247 = vsyncadd [#allocation4], 4294967040 }
  0xee   :  { %172 = vsyncpa [#allocation4], 1 }

// kernel: flash_mha_forward.4
= control target key start
LH: loop header
LB: loop body
LE: loop exit
PB: predicated region body
PF: predicated region fallthrough
CT: control target
= control target key end

     0   :  { %s1296_s12 = smov 0   ;;  %s1298_s13 = smov 0   ;;  %s1483_s0 = inlined_call_operand.vmem [shape: bf16[2,8,384], index: 0, kind: input, shape index: {}, may-alias: {0,1,2}]   ;;  %s1484_s1 = inlined_call_operand.vmem [shape: bf16[2,8,384], index: 1, kind: input, shape index: {}, may-alias: {0,1,2}]   ;;  %s1485_s2 = inlined_call_operand.vmem [shape: bf16[2,8,384], index: 2, kind: input, shape index: {}, may-alias: {0,1,2}]   ;;  %s1486_s3 = inlined_call_operand.vmem [shape: bf16[2,8,128], index: 3, kind: output, shape index: {}]  }
   0x1   :  { %s1300_s14 = smov 0  }
   0x2 LB: > { %s32_s15 = sadd.s32 1, %s1263_s13  ;;  %p1082_p0 = scmp.ge.s32.totalorder %s1267_s14, 1  ;;  %s1267_s14 = sphi %s1300_s14, %s13_s14   ;;  %s1263_s13 = sphi %s1298_s13, %s1488_s13   ;;  %s1259_s12 = sphi %s1296_s12, %s1487_s12  }
   0x3   : > { %p34_p1 = scmp.ge.s32.totalorder %s32_s15, 2  ;;  %p198_p2 = scmp.lt.s32.totalorder %s1267_s14, 3 }
   0x5   : > { %s1490_s15 = smov (%p34_p1, %s32_s15), 0  ;;  %p199_p3 = pnand %p1082_p0, %p198_p2 }
   0x6   : > { %p248_p4 = scmp.lt.s32.totalorder (!%p199_p3), %s1259_s12, 1  ;;  %s1273_s23 = smov (!%p199_p3), 96  }
   0x7   : > { %202 = sbr.rel (%p199_p3) target bundleno = 1417 (0x589), region = 32  ;;  %s1274_s24 = smov (!%p199_p3), 64  }
   0x8   : > { %s1275_s25 = smov (!%p199_p3), 32  }
   0xc   : > { %vm298_vm0 = vcmask 261120   ;;  %v1269_v0 = vmov 0.0   ;;  %vm1270_vm1 = vmmov 0   ;;  %s1492_s12 = smov (!%p248_p4, %s1259_s12), 1  ;;  %vm289_vm2 = vcmask 7168  }
   0xd   : > { %1130 = vmatprep.subr.bf16.mxu0 %v1269_v0  ;;  %299 = vst.msk [vmem:[#allocation4] sm:$0xff] %vm298_vm0, %v1269_v0  ;;  %300 = vst.msk [vmem:[#allocation4 + $0x8] sm:$0xff] %vm298_vm0, %v1269_v0  ;;  %1132 = vmatprep.mubr.msk.bf16.mxu0 %vm1270_vm1, %v1269_v0  ;;  %s1331_s16 = smul.u32 12, %s1492_s12  ;;  %v1271_v4 = vmov -inf   ;;  %vm354_vm3 = vcmask 64512   ;;  %v1272_v10 = vmov 0  }
   0xe   : > { %301 = vst.msk [vmem:[#allocation4 + $0x10] sm:$0xff] %vm298_vm0, %v1269_v0  ;;  %302 = vst.msk [vmem:[#allocation4 + $0x18] sm:$0xff] %vm298_vm0, %v1269_v0  ;;  %1136 = vmatprep.subr.bf16.mxu1 %v1269_v0  ;;  %1138 = vmatprep.mubr.msk.bf16.mxu1 %vm1270_vm1, %v1269_v0  ;;  %vm389_vm4 = vcmask 1043456   ;;  %vm941_vm5 = vcmask 523264   ;;  %s1086_s29 = sshll.u32 %s1492_s12, 2  ;;  %vm943_vm6 = vcmask 785408  }
   0xf   : > { %s1337_s19 = scalar_lea.vmem %s1484_s1, %s1331_s16  ;;  %s1344_s22 = scalar_lea.vmem %s1483_s0, %s1331_s16  ;;  %290 = vst.msk [vmem:[#allocation2] sm:$0xff] %vm289_vm2, %v1271_v4  ;;  %291 = vst.msk [vmem:[#allocation2 + $0x8] sm:$0xff] %vm289_vm2, %v1271_v4  ;;  %1210 = vset.pattern.permute.xlu0 %v1272_v10  ;;  %1211 = vset.pattern.permute.xlu1 %v1272_v10 }
  0x10   : > { %v1087_v1 = vld [vmem:[%s1337_s19 + $0x4] sm:$0xf]  ;;  %v303_v3 = vld [vmem:[%s1344_s22] sm:$0xf]  ;;  %292 = vst.msk [vmem:[#allocation2 + $0x10] sm:$0xff] %vm289_vm2, %v1271_v4  ;;  %293 = vst.msk [vmem:[#allocation2 + $0x18] sm:$0xff] %vm289_vm2, %v1271_v4  ;;  %s1391_s28 = scalar_lea.vmem %s1485_s2, %s1331_s16  ;;  %s283_s5 = scalar_lea.vmem %s1486_s3, %s1086_s29 }
  0x11   : > { %v311_v2 = vsel %vm298_vm0, %v1087_v1, 0  ;;  %294 = vst.msk [vmem:[#allocation3] sm:$0xff] %vm289_vm2, %v1269_v0  ;;  %295 = vst.msk [vmem:[#allocation3 + $0x8] sm:$0xff] %vm289_vm2, %v1269_v0  ;;  %v1212_v11 = vld [vmem:[%s1337_s19 + $0x4] ss:$0 sps:$4 sm:$0xff]  }
  0x12   : > { %1131 = vmatpush3.bf16.xpose.msra.mxu0 %v311_v2  ;;  %296 = vst.msk [vmem:[#allocation3 + $0x10] sm:$0xff] %vm289_vm2, %v1269_v0  ;;  %297 = vst.msk [vmem:[#allocation3 + $0x18] sm:$0xff] %vm289_vm2, %v1269_v0  ;;  %447 = vrot.lane.b32.xlu1 %v1212_v11, %s1273_s23  ;;  %v1213_v12 = vld [vmem:[%s1344_s22] ss:$0 sps:$4 sm:$0xff]   ;;  %v1214_v13 = vld [vmem:[%s1337_s19 + $0x4] ss:$0 sps:$4 sm:$0xff]  }
  0x13   : > { %1148 = vmatprep.subr.bf16.mxu0 %v1269_v0  ;;  %v1215_v14 = vld [vmem:[%s1344_s22] ss:$0 sps:$4 sm:$0xff]   ;;  %v1216_v15 = vld [vmem:[%s1337_s19 + $0x4] ss:$0 sps:$4 sm:$0xff]   ;;  %v1088_v21 = vld [vmem:[%s1391_s28 + $0x8] sm:$0xf] }
  0x14   : > { %v1217_v16 = vld [vmem:[%s1344_s22] ss:$0 sps:$4 sm:$0xff]   ;;  %v391_v22 = vsel %vm389_vm4, %v1088_v21, 0 }
  0x15   : > { %1137 = vmatpush3.bf16.msra.mxu1 %v391_v22 }
  0x16   : > { %442 = vrot.lane.b32.xlu1 %v1213_v12, %s1273_s23  ;;  %v1377_v17 = vld [vmem:[#allocation2] sm:$0xff]  ;;  %1142 = vmatprep.subr.bf16.mxu1 %v1269_v0  ;;  %v1420_v56 = vld [vmem:[#allocation2 + $0x8] sm:$0xff] }
  0x17   : > { %v1425_v60 = vld [vmem:[#allocation2 + $0x10] sm:$0xff]  ;;  %v790_v1 = vld [vmem:[#allocation2 + $0x18] sm:$0xff] }
  0x19   : > { %1133 = vmatmul.mubr.msk.bf16.vlgmr.msra.gmra.mxu0 %vm298_vm0, %v303_v3 }
  0x1a   : > { %1150 = vmatprep.mubr.msk.bf16.mxu0 %vm1270_vm1, %v1269_v0  ;;  %594 = vrot.lane.b32.xlu1 %v1214_v13, %s1274_s24 }
  0x1e   : > { %589 = vrot.lane.b32.xlu1 %v1215_v14, %s1274_s24 }
  0x22   : > { %741 = vrot.lane.b32.xlu1 %v1216_v15, %s1275_s25 }
  0x26   : > { %736 = vrot.lane.b32.xlu1 %v1217_v16, %s1275_s25 }
  0x84   : > { %v448_v26 = vpop.permute.xlu1 %447 }
  0x85   : > { %v453_v29 = vsel %vm298_vm0, %v448_v26, 0 }
  0x88   : > { %v443_v27 = vpop.permute.xlu1 %442 }
  0x8c   : > { %v595_v31 = vpop.permute.xlu1 %594 }
  0x8d   : > { %v600_v33 = vsel %vm298_vm0, %v595_v31, 0 }
  0x90   : > { %v590_v32 = vpop.permute.xlu1 %589 }
  0x94   : > { %v742_v34 = vpop.permute.xlu1 %741 }
  0x95   : > { %v747_v35 = vsel %vm298_vm0, %v742_v34, 0 }
  0x98   : > { %v737_v36 = vpop.permute.xlu1 %736 }
  0xd9   : > { %v347_v5 = vpop.f32.mrf.mxu0 }
  0xda   : > { %v355_v6 = vsel %vm354_vm3, %v347_v5, -inf }
  0xdb   : > { %356 = vmax.xlane.f32.xlu0 %v355_v6  ;;  %v1134_v7 = vpop.f32.mrf.mxu0  ;;  %v1219_v6 = vld [vmem:[%s1391_s28 + $0x8] ss:$0 sps:$4 sm:$0xff]  }
  0xdc   : > { %v1220_v7 = vld [vmem:[%s1391_s28 + $0x8] ss:$0 sps:$4 sm:$0xff]  }
  0xdd   : > { %v350_v8 = vpop.f32.mrf.mxu0 }
  0xdf   : > { %v1135_v9 = vpop.f32.mrf.mxu0 }
 0x164   : > { %v357_v18 = vpop.xlane.xlu0 %356 }
 0x165   : > { %v1380_v19 = vmax.f32 %v1377_v17, %v357_v18 }
 0x167   : > { %v359_v20 = vsub.f32 %v1377_v17, %v1380_v19  ;;  %435 = vst.msk [vmem:[#allocation2] sm:$0xff] %vm289_vm2, %v1380_v19  ;;  %364 = vperm.xlu0 %1210, %v1380_v19  }
 0x1e2   : > { %v365_v23 = vpop.permute.xlu0 %364 }
 0x1e3   : > { %v367_v24 = vsub.f32 %v347_v5, %v365_v23  ;;  %v1218_v5 = vld [vmem:[%s1391_s28 + $0x8] ss:$0 sps:$4 sm:$0xff]  }
 0x1e5   : > { %v368_v25 = vmul.f32 1.442695, %v367_v24 }
 0x1e7   : > { %1221 = vpow2.f32 %v368_v25 }
 0x1f4   : > { %v1396_v28 = vpop.eup %1221 }
 0x1f5   : > { %v385_v30 = vpack.c.bf16 %v1396_v28, %v1396_v28  ;;  %v372_v8 = vsel %vm354_vm3, %v1396_v28, 0.0 }
 0x1f7   : > { %1139 = vmatmul.mubr.msk.bf16.vlgmr.msra.gmra.mxu1 %vm354_vm3, %v385_v30 }
 0x1f8   : > { %1143 = vmatpush3.bf16.xpose.msra.mxu1 %v453_v29  ;;  %1144 = vmatprep.mubr.msk.bf16.mxu1 %vm1270_vm1, %v1269_v0 }
 0x1f9   : > { %1154 = vmatprep.subr.bf16.mxu1 %v1269_v0 }
 0x1ff   : > { %1145 = vmatmul.mubr.msk.bf16.vlgmr.msra.gmra.mxu1 %vm298_vm0, %v443_v27 }
 0x200   : > { %1155 = vmatpush3.bf16.xpose.msra.mxu1 %v600_v33  ;;  %1156 = vmatprep.mubr.msk.bf16.mxu1 %vm1270_vm1, %v1269_v0  ;;  %v360_v33 = vmul.f32 1.442695, %v359_v20 }
 0x201   : > { %1166 = vmatprep.subr.bf16.mxu1 %v1269_v0 }
 0x207   : > { %1157 = vmatmul.mubr.msk.bf16.vlgmr.msra.gmra.mxu1 %vm298_vm0, %v590_v32 }
 0x208   : > { %1167 = vmatpush3.bf16.xpose.msra.mxu1 %v747_v35  ;;  %1168 = vmatprep.mubr.msk.bf16.mxu1 %vm1270_vm1, %v1269_v0 }
 0x20f   : > { %1169 = vmatmul.mubr.msk.bf16.vlgmr.msra.gmra.mxu1 %vm298_vm0, %v737_v36 }
 0x2b7   : > { %v1415_v37 = vpop.f32.mrf.mxu1 }
 0x2b9   : > { %v1140_v38 = vpop.f32.mrf.mxu1 }
 0x2bb   : > { %v430_v39 = vpop.f32.mrf.mxu1 }
 0x2bd   : > { %v1141_v40 = vpop.f32.mrf.mxu1 }
 0x2bf   : > { %v489_v41 = vpop.f32.mrf.mxu1 }
 0x2c0   : > { %v497_v42 = vsel %vm354_vm3, %v489_v41, -inf }
 0x2c1   : > { %498 = vmax.xlane.f32.xlu1 %v497_v42  ;;  %v1146_v43 = vpop.f32.mrf.mxu1 }
 0x2c3   : > { %v492_v44 = vpop.f32.mrf.mxu1 }
 0x2c5   : > { %v1147_v45 = vpop.f32.mrf.mxu1 }
 0x2c7   : > { %v636_v46 = vpop.f32.mrf.mxu1 }
 0x2c8   : > { %v644_v47 = vsel %vm354_vm3, %v636_v46, -inf }
 0x2c9   : > { %645 = vmax.xlane.f32.xlu0 %v644_v47  ;;  %v1158_v48 = vpop.f32.mrf.mxu1 }
 0x2cb   : > { %v639_v49 = vpop.f32.mrf.mxu1 }
 0x2cd   : > { %v1159_v50 = vpop.f32.mrf.mxu1 }
 0x2ce   : > { %v513_v50 = vld [vmem:[#allocation3 + $0x8] sm:$0xff] }
 0x2cf   : > { %v783_v51 = vpop.f32.mrf.mxu1 }
 0x2d0   : > { %v791_v52 = vsel %vm354_vm3, %v783_v51, -inf }
 0x2d1   : > { %792 = vmax.xlane.f32.xlu1 %v791_v52  ;;  %v1170_v53 = vpop.f32.mrf.mxu1 }
 0x2d3   : > { %v786_v54 = vpop.f32.mrf.mxu1 }
 0x2d4   : > { %v660_v54 = vld [vmem:[#allocation3 + $0x10] sm:$0xff] }
 0x2d5   : > { %v1171_v55 = vpop.f32.mrf.mxu1 }
 0x34a   : > { %v499_v57 = vpop.xlane.xlu1 %498 }
 0x34b   : > { %v500_v58 = vmax.f32 %v1420_v56, %v499_v57 }
 0x34d   : > { %v501_v59 = vsub.f32 %v1420_v56, %v500_v58  ;;  %582 = vst.msk [vmem:[#allocation2 + $0x8] sm:$0xff] %vm289_vm2, %v500_v58  ;;  %506 = vperm.xlu1 %1211, %v500_v58  }
 0x34f   : > { %v502_v35 = vmul.f32 1.442695, %v501_v59  ;;  %v807_v59 = vld [vmem:[#allocation3 + $0x18] sm:$0xff] }
 0x352   : > { %v646_v61 = vpop.xlane.xlu0 %645 }
 0x353   : > { %v647_v62 = vmax.f32 %v1425_v60, %v646_v61 }
 0x355   : > { %v648_v63 = vsub.f32 %v1425_v60, %v647_v62  ;;  %729 = vst.msk [vmem:[#allocation2 + $0x10] sm:$0xff] %vm289_vm2, %v647_v62  ;;  %653 = vperm.xlu0 %1210, %v647_v62   ;;  %v378_v60 = vld [vmem:[#allocation4] sm:$0xff] }
 0x357   : > { %v649_v39 = vmul.f32 1.442695, %v648_v63 }
 0x35a   : > { %v793_v2 = vpop.xlane.xlu1 %792 }
 0x35b   : > { %v794_v3 = vmax.f32 %v790_v1, %v793_v2 }
 0x35d   : > { %v795_v4 = vsub.f32 %v790_v1, %v794_v3  ;;  %876 = vst.msk [vmem:[#allocation2 + $0x18] sm:$0xff] %vm289_vm2, %v794_v3  ;;  %800 = vperm.xlu1 %1211, %v794_v3  }
 0x35f   : > { %v796_v38 = vmul.f32 1.442695, %v795_v4 }
 0x361   : > { %532 = vrot.lane.b32.xlu1 %v1218_v5, %s1273_s23 }
 0x365   : > { %679 = vrot.lane.b32.xlu1 %v1219_v6, %s1274_s24 }
 0x369   : > { %826 = vrot.lane.b32.xlu1 %v1220_v7, %s1275_s25 }
 0x38d   : > { %373 = vadd.xlane.f32.xlu1 %v372_v8 }
 0x3c8   : > { %v507_v9 = vpop.permute.xlu1 %506 }
 0x3c9   : > { %v509_v10 = vsub.f32 %v489_v41, %v507_v9  ;;  %v370_v41 = vld [vmem:[#allocation3] sm:$0xff] }
 0x3cb   : > { %v510_v11 = vmul.f32 1.442695, %v509_v10 }
 0x3cd   : > { %1223 = vpow2.f32 %v510_v11 }
 0x3d0   : > { %v654_v12 = vpop.permute.xlu0 %653 }
 0x3d1   : > { %v656_v13 = vsub.f32 %v636_v46, %v654_v12 }
 0x3d3   : > { %v657_v14 = vmul.f32 1.442695, %v656_v13 }
 0x3d5   : > { %1225 = vpow2.f32 %v657_v14 }
 0x3d8   : > { %v801_v15 = vpop.permute.xlu1 %800 }
 0x3d9   : > { %v803_v16 = vsub.f32 %v783_v51, %v801_v15 }
 0x3da   : > { %v1224_v18 = vpop.eup %1223 }
 0x3db   : > { %v804_v21 = vmul.f32 1.442695, %v803_v16  ;;  %v515_v22 = vsel %vm354_vm3, %v1224_v18, 0.0  ;;  %v528_v25 = vpack.c.bf16 %v1224_v18, %v1224_v18 }
 0x3dc   : > { %516 = vadd.xlane.f32.xlu0 %v515_v22  ;;  %v533_v23 = vpop.permute.xlu1 %532 }
 0x3dd   : > { %1227 = vpow2.f32 %v804_v21  ;;  %v538_v24 = vsel %vm389_vm4, %v533_v23, 0 }
 0x3de   : > { %1149 = vmatpush3.bf16.msra.mxu0 %v538_v24  ;;  %1229 = vpow2.f32 %v360_v33 }
 0x3df   : > { %1160 = vmatprep.subr.bf16.mxu0 %v1269_v0  ;;  %1231 = vpow2.f32 %v502_v35 }
 0x3e0   : > { %v680_v26 = vpop.permute.xlu1 %679  ;;  %1233 = vpow2.f32 %v796_v38 }
 0x3e1   : > { %1151 = vmatmul.mubr.msk.bf16.vlgmr.msra.gmra.mxu0 %vm354_vm3, %v528_v25  ;;  %v685_v27 = vsel %vm389_vm4, %v680_v26, 0  ;;  %1235 = vpow2.f32 %v649_v39  ;;  %v668_v26 = vld [vmem:[#allocation4 + $0x10] sm:$0xff] }
 0x3e2   : > { %v1226_v28 = vpop.eup %1225  ;;  %1161 = vmatpush3.bf16.msra.mxu0 %v685_v27  ;;  %1162 = vmatprep.mubr.msk.bf16.mxu0 %vm1270_vm1, %v1269_v0 }
 0x3e3   : > { %v662_v29 = vsel %vm354_vm3, %v1226_v28, 0.0  ;;  %1172 = vmatprep.subr.bf16.mxu0 %v1269_v0  ;;  %v675_v31 = vpack.c.bf16 %v1226_v28, %v1226_v28 }
 0x3e4   : > { %663 = vadd.xlane.f32.xlu0 %v662_v29  ;;  %v827_v30 = vpop.permute.xlu1 %826 }
 0x3e5   : > { %v832_v32 = vsel %vm389_vm4, %v827_v30, 0 }
 0x3e9   : > { %1163 = vmatmul.mubr.msk.bf16.vlgmr.msra.gmra.mxu0 %vm354_vm3, %v675_v31 }
 0x3ea   : > { %v1228_v34 = vpop.eup %1227  ;;  %1173 = vmatpush3.bf16.msra.mxu0 %v832_v32  ;;  %1174 = vmatprep.mubr.msk.bf16.mxu0 %vm1270_vm1, %v1269_v0 }
 0x3eb   : > { %v809_v36 = vsel %vm354_vm3, %v1228_v34, 0.0  ;;  %v822_v40 = vpack.c.bf16 %v1228_v34, %v1228_v34  ;;  %v1230_v17 = vpop.eup %1229  ;;  %v815_v34 = vld [vmem:[#allocation4 + $0x18] sm:$0xff] }
 0x3ec   : > { %810 = vadd.xlane.f32.xlu1 %v809_v36  ;;  %v1232_v19 = vpop.eup %1231  ;;  %v371_v42 = vmul.f32 %v1230_v17, %v370_v41 }
 0x3ed   : > { %v1234_v20 = vpop.eup %1233  ;;  %v514_v51 = vmul.f32 %v1232_v19, %v513_v50 }
 0x3ee   : > { %v1236_v0 = vpop.eup %1235  ;;  %v808_v61 = vmul.f32 %v1234_v20, %v807_v59 }
 0x3ef   : > { %v661_v55 = vmul.f32 %v1236_v0, %v660_v54 }
 0x3f1   : > { %1175 = vmatmul.mubr.msk.bf16.vlgmr.msra.gmra.mxu0 %vm354_vm3, %v822_v40 }
 0x3fa   : > { %381 = vperm.xlu0 %1210, %v1230_v17  }
 0x3fd   : > { %524 = vperm.xlu1 %1211, %v1232_v19  }
 0x3fe   : > { %818 = vperm.xlu0 %1210, %v1234_v20  }
 0x401   : > { %671 = vperm.xlu1 %1211, %v1236_v0  }
 0x416   : > { %v374_v43 = vpop.xlane.xlu1 %373 }
 0x417   : > { %v375_v44 = vadd.f32 %v374_v43, %v371_v42 }
 0x419   : > { %377 = vst.msk [vmem:[#allocation3] sm:$0xff] %vm289_vm2, %v375_v44 }
 0x420   : > { %v880_v45 = vld [vmem:[#allocation3] sm:$0xff] }
 0x421   : > { %1237 = vrcp.f32 %v880_v45 }
 0x42e   : > { %v1238_v46 = vpop.eup %1237 }
 0x42f   : > { %v882_v47 = vmul.f32 %v1238_v46, %v880_v45 }
 0x431   : > { %v883_v48 = vsub.f32 2.0, %v882_v47 }
 0x433   : > { %v884_v49 = vmul.f32 %v1238_v46, %v883_v48 }
 0x435   : > { %888 = vperm.xlu1 %1211, %v884_v49  }
 0x465   : > { %v517_v52 = vpop.xlane.xlu0 %516 }
 0x466   : > { %v518_v53 = vadd.f32 %v517_v52, %v514_v51 }
 0x468   : > { %519 = vst.msk [vmem:[#allocation3 + $0x8] sm:$0xff] %vm289_vm2, %v518_v53 }
 0x46d   : > { %v664_v56 = vpop.xlane.xlu0 %663 }
 0x46e   : > { %v665_v57 = vadd.f32 %v664_v56, %v661_v55 }
 0x46f   : > { %v892_v58 = vld [vmem:[#allocation3 + $0x8] sm:$0xff] }
 0x470   : > { %666 = vst.msk [vmem:[#allocation3 + $0x10] sm:$0xff] %vm289_vm2, %v665_v57  ;;  %1239 = vrcp.f32 %v892_v58 }
 0x475   : > { %v811_v62 = vpop.xlane.xlu1 %810  ;;  %v382_v63 = vpop.permute.xlu0 %381 }
 0x476   : > { %v812_v1 = vadd.f32 %v811_v62, %v808_v61  ;;  %v384_v2 = vmul.f32 %v382_v63, %v378_v60 }
 0x477   : > { %v904_v3 = vld [vmem:[#allocation3 + $0x10] sm:$0xff] }
 0x478   : > { %813 = vst.msk [vmem:[#allocation3 + $0x18] sm:$0xff] %vm289_vm2, %v812_v1  ;;  %v433_v4 = vadd.f32 %v1415_v37, %v384_v2  ;;  %1241 = vrcp.f32 %v904_v3  ;;  %v521_v37 = vld [vmem:[#allocation4 + $0x8] sm:$0xff] }
 0x479   : > { %v525_v21 = vpop.permute.xlu1 %524  ;;  %v819_v35 = vpop.permute.xlu0 %818 }
 0x47a   : > { %434 = vst.msk [vmem:[#allocation4] sm:$0xff] %vm298_vm0, %v433_v4  ;;  %v527_v22 = vmul.f32 %v525_v21, %v521_v37  ;;  %v821_v39 = vmul.f32 %v819_v35, %v815_v34 }
 0x47d   : > { %v1240_v5 = vpop.eup %1239  ;;  %v672_v27 = vpop.permute.xlu1 %671 }
 0x47e   : > { %v894_v6 = vmul.f32 %v1240_v5, %v892_v58  ;;  %v674_v30 = vmul.f32 %v672_v27, %v668_v26 }
 0x47f   : > { %v916_v7 = vld [vmem:[#allocation3 + $0x18] sm:$0xff] }
 0x480   : > { %v895_v8 = vsub.f32 2.0, %v894_v6  ;;  %1243 = vrcp.f32 %v916_v7 }
 0x481   : > { %v885_v51 = vld [vmem:[#allocation4] sm:$0xff] }
 0x482   : > { %v896_v9 = vmul.f32 %v1240_v5, %v895_v8 }
 0x484   : > { %900 = vperm.xlu0 %1210, %v896_v9  }
 0x485   : > { %v1242_v10 = vpop.eup %1241 }
 0x486   : > { %v906_v11 = vmul.f32 %v1242_v10, %v904_v3 }
 0x488   : > { %v907_v12 = vsub.f32 2.0, %v906_v11 }
 0x48a   : > { %v908_v13 = vmul.f32 %v1242_v10, %v907_v12 }
 0x48c   : > { %912 = vperm.xlu1 %1211, %v908_v13  }
 0x48d   : > { %v1244_v14 = vpop.eup %1243 }
 0x48e   : > { %v918_v15 = vmul.f32 %v1244_v14, %v916_v7 }
 0x490   : > { %v919_v16 = vsub.f32 2.0, %v918_v15 }
 0x492   : > { %v920_v18 = vmul.f32 %v1244_v14, %v919_v16 }
 0x494   : > { %924 = vperm.xlu0 %1210, %v920_v18  }
 0x4a1   : > { %v574_v23 = vpop.f32.mrf.mxu0 }
 0x4a2   : > { %v580_v24 = vadd.f32 %v574_v23, %v527_v22 }
 0x4a3   : > { %v1152_v25 = vpop.f32.mrf.mxu0 }
 0x4a4   : > { %581 = vst.msk [vmem:[#allocation4 + $0x8] sm:$0xff] %vm298_vm0, %v580_v24 }
 0x4a5   : > { %v577_v28 = vpop.f32.mrf.mxu0 }
 0x4a7   : > { %v1153_v29 = vpop.f32.mrf.mxu0 }
 0x4a9   : > { %v721_v31 = vpop.f32.mrf.mxu0 }
 0x4aa   : > { %v727_v32 = vadd.f32 %v721_v31, %v674_v30 }
 0x4ab   : > { %v1164_v33 = vpop.f32.mrf.mxu0  ;;  %v897_v42 = vld [vmem:[#allocation4 + $0x8] sm:$0xff] }
 0x4ac   : > { %728 = vst.msk [vmem:[#allocation4 + $0x10] sm:$0xff] %vm298_vm0, %v727_v32 }
 0x4ad   : > { %v724_v36 = vpop.f32.mrf.mxu0 }
 0x4af   : > { %v1165_v38 = vpop.f32.mrf.mxu0 }
 0x4b0   : > { %v889_v44 = vpop.permute.xlu1 %888 }
 0x4b1   : > { %v868_v40 = vpop.f32.mrf.mxu0  ;;  %v891_v53 = vmul.f32 %v889_v44, %v885_v51 }
 0x4b2   : > { %v874_v17 = vadd.f32 %v868_v40, %v821_v39 }
 0x4b3   : > { %v1176_v19 = vpop.f32.mrf.mxu0  ;;  %v909_v46 = vld [vmem:[#allocation4 + $0x10] sm:$0xff] }
 0x4b4   : > { %875 = vst.msk [vmem:[#allocation4 + $0x18] sm:$0xff] %vm298_vm0, %v874_v17 }
 0x4b5   : > { %v871_v20 = vpop.f32.mrf.mxu0 }
 0x4b7   : > { %v1177_v0 = vpop.f32.mrf.mxu0 }
 0x4bb   : > { %v921_v49 = vld [vmem:[#allocation4 + $0x18] sm:$0xff] }
 0x4ff   : > { %v901_v41 = vpop.permute.xlu0 %900 }
 0x500   : > { %v903_v43 = vmul.f32 %v901_v41, %v897_v42 }
 0x502   : > { %929 = vrot.lane.b32.xlu1 %v903_v43, %s1275_s25 }
 0x507   : > { %v913_v45 = vpop.permute.xlu1 %912 }
 0x508   : > { %v915_v47 = vmul.f32 %v913_v45, %v909_v46 }
 0x50a   : > { %933 = vrot.lane.b32.xlu0 %v915_v47, %s1274_s24 }
 0x50f   : > { %v925_v48 = vpop.permute.xlu0 %924 }
 0x510   : > { %v927_v50 = vmul.f32 %v925_v48, %v921_v49 }
 0x512   : > { %937 = vrot.lane.b32.xlu1 %v927_v50, %s1273_s23 }
 0x574   : > { %v930_v52 = vpop.permute.xlu1 %929 }
 0x575   : > { %v940_v55 = vsel %vm298_vm0, %v891_v53, %v930_v52 }
 0x57c   : > { %v934_v54 = vpop.permute.xlu0 %933 }
 0x57d   : > { %v942_v56 = vsel %vm941_vm5, %v940_v55, %v934_v54 }
 0x584   : > { %v938_v57 = vpop.permute.xlu1 %937 }
 0x585   : > { %v944_v58 = vsel %vm943_vm6, %v942_v56, %v938_v57 }
 0x586   : > { %v945_v59 = vpack.c.bf16 %v944_v58, %v944_v58 }
 0x588   : > { %946 = vst [vmem:[%s283_s5] sm:$0xf] %v945_v59 }
 0x589 PF: > { %s13_s14 = sadd.s32 1, %s1267_s14   ;;  %s1487_s12 = smov %s1263_s13 }
 0x58a   : > { %p10_p5 = scmp.ge.s32.totalorder %s13_s14, 4   ;;  %s1488_s13 = smov %s1490_s15 }
 0x58c   :  { %12 = sbr.rel (!%p10_p5) target bundleno = 2 (0x2), region = 85 }

</bundles_post_ra>
